<compile_context>
chip_gen: v7x
topology: tpu7x:2x2x1
jax: 0.10.0
libtpu: 0.0.40
codegen_flags: <defaults>
</compile_context>

<pallas_src>
import math

import jax
import jax.numpy as jnp
from jax.experimental import pallas as pl
from jax.experimental.pallas import tpu as pltpu

# --------------------- small synthetic Llama-style config ---------------------
HIDDEN = 32
N_HEADS = 4
N_KV_HEADS = 2
HEAD_DIM = HIDDEN // N_HEADS            # 8
INTERMEDIATE = 64
VOCAB = 128
N_LAYERS = 2                            # stands in for `layers[SPLIT_INDEX:]`
RMS_EPS = 1e-5
ROPE_THETA = 10000.0

HALF = HEAD_DIM // 2
KV_REP = N_HEADS // N_KV_HEADS          # GQA repeat factor (by index, no repeat)
Q_DIM = N_HEADS * HEAD_DIM              # 32
KV_DIM = N_KV_HEADS * HEAD_DIM          # 16
# fused projection column layout: [Wq | rot_half(Wq) | Wk | rot_half(Wk) | Wv]
PROJ_DIM = 2 * Q_DIM + 2 * KV_DIM + KV_DIM   # 112
NEG_INF = -1e30                         # safe: scores stay in f32


# ------------------------------ kernel helpers ------------------------------
def _rms(x, w):
    """RMSNorm in f32: x (T, H), w (1, H)."""
    var = jnp.mean(x * x, axis=-1, keepdims=True)
    return x * jax.lax.rsqrt(var + RMS_EPS) * w


def _bf16_dot(a, b):
    """a @ b with bf16 MXU inputs and f32 accumulation."""
    return jnp.dot(a.astype(jnp.bfloat16), b.astype(jnp.bfloat16),
                   preferred_element_type=jnp.float32)


def _bf16_dot_t(a, b):
    """a @ b.T with bf16 MXU inputs and f32 accumulation."""
    return jax.lax.dot_general(a.astype(jnp.bfloat16), b.astype(jnp.bfloat16),
                               (((1,), (1,)), ((), ())),
                               preferred_element_type=jnp.float32)


# -------------------------- fully fused forward kernel --------------------------
def _second_half_kernel(x_ref, cosq_ref, sinq_ref, cosk_ref, sink_ref, bias_ref,
                        ln1_ref, wproj_ref, wo_ref,
                        ln2_ref, wgu_ref, wd_ref,
                        fnorm_ref, lmhead_ref,
                        logits_ref,
                        h_scratch):
    layer = pl.program_id(1)

    # Load the residual stream into VMEM scratch once per batch-tile.
    @pl.when(layer == 0)
    def _init():
        h_scratch[...] = x_ref[...].astype(jnp.float32)

    h = h_scratch[...]                                   # (T, H) f32

    # ------------------------------ attention ------------------------------
    normed = _rms(h, ln1_ref[...])
    proj = _bf16_dot(normed, wproj_ref[...])             # (T, PROJ_DIM) f32

    q = proj[:, 0:Q_DIM]
    q_rh = proj[:, Q_DIM:2 * Q_DIM]                      # rotate_half(q), via weights
    k = proj[:, 2 * Q_DIM:2 * Q_DIM + KV_DIM]
    k_rh = proj[:, 2 * Q_DIM + KV_DIM:2 * Q_DIM + 2 * KV_DIM]
    v = proj[:, 2 * Q_DIM + 2 * KV_DIM:]

    # RoPE on the full Q / K blocks (2 FMAs each); cos_q/sin_q already carry
    # the 1/sqrt(head_dim) softmax scale.
    q_rot = q * cosq_ref[...] + q_rh * sinq_ref[...]     # (T, Q_DIM)
    k_rot = k * cosk_ref[...] + k_rh * sink_ref[...]     # (T, KV_DIM)

    bias = bias_ref[...]                                 # (T, T) block-diag causal

    o_heads = []
    # TODO(synk): at real head counts (32) switch to lax.fori_loop / a
    # heads-batched einsum to avoid vreg spills from full unrolling.
    for hh in range(N_HEADS):                            # small static unroll
        kvh = hh // KV_REP                               # GQA by index, no repeat
        q_h = q_rot[:, hh * HEAD_DIM:(hh + 1) * HEAD_DIM]
        k_h = k_rot[:, kvh * HEAD_DIM:(kvh + 1) * HEAD_DIM]
        v_h = v[:, kvh * HEAD_DIM:(kvh + 1) * HEAD_DIM]

        s = _bf16_dot_t(q_h, k_h) + bias                 # one K=HEAD_DIM matmul
        s = s - jnp.max(s, axis=-1, keepdims=True)
        p = jnp.exp(s)
        p = p * pl.reciprocal(jnp.sum(p, axis=-1, keepdims=True), approx=True)

        o_heads.append(_bf16_dot(p, v_h))                # (T, HEAD_DIM)

    attn = jnp.concatenate(o_heads, axis=-1)             # (T, H), single vreg-ish
    h = h + _bf16_dot(attn, wo_ref[...])                 # ONE fused Wo matmul

    # ---------------------------- SwiGLU MLP ----------------------------
    normed2 = _rms(h, ln2_ref[...])
    gu = _bf16_dot(normed2, wgu_ref[...])                # (T, 2*F), fused gate|up
    g = gu[:, :INTERMEDIATE]
    u = gu[:, INTERMEDIATE:]
    m = g * pl.reciprocal(1.0 + jnp.exp(-g), approx=True) * u   # SiLU on EUP
    h = h + _bf16_dot(m, wd_ref[...])                    # residual

    h_scratch[...] = h

    # --------------------- final norm + lm_head (last layer) ---------------------
    @pl.when(layer == pl.num_programs(1) - 1)
    def _final():
        nf = _rms(h, fnorm_ref[...])
        # TODO(synk): at real vocab (128k) tile lm_head over a vocab grid axis
        # with wide (>=2048) lane-dense output blocks.
        logits_ref[...] = _bf16_dot(nf, lmhead_ref[...])  # (T, VOCAB=128) lane-dense


# ------------------------------ wrapper / glue ------------------------------
def _rope_tables(seq_len, theta=ROPE_THETA):
    """Full-width HF-style tables (S, HEAD_DIM): cos/sin = [half | half]."""
    inv_freq = 1.0 / (theta ** (jnp.arange(0, HEAD_DIM, 2, dtype=jnp.float32) / HEAD_DIM))
    pos = jnp.arange(seq_len, dtype=jnp.float32)[:, None]
    freqs = pos * inv_freq[None, :]                       # (S, HALF)
    cos = jnp.concatenate([jnp.cos(freqs), jnp.cos(freqs)], axis=-1)
    sin = jnp.concatenate([jnp.sin(freqs), jnp.sin(freqs)], axis=-1)
    return cos, sin


def _expand_tables(cos, sin, n_heads, b_tile, scale):
    """(S, HEAD_DIM) -> (b_tile*S, n_heads*HEAD_DIM), optionally pre-scaled."""
    return (jnp.tile(cos, (b_tile, n_heads)) * scale,
            jnp.tile(sin, (b_tile, n_heads)) * scale)


def _mask_bias(b_tile, seq):
    """Block-diagonal causal additive bias (T, T) for b_tile folded sequences."""
    t = jnp.arange(b_tile * seq)
    same_seq = (t[:, None] // seq) == (t[None, :] // seq)
    causal = (t[:, None] % seq) >= (t[None, :] % seq)
    return jnp.where(same_seq & causal, 0.0, NEG_INF).astype(jnp.float32)


def second_half_forward(hidden_states, params, *, b_tile=None):
    B, S, H = hidden_states.shape
    assert H == HIDDEN
    if b_tile is None:
        b_tile = B        # fold whole batch per block; on v7x use B // 2
    assert B % b_tile == 0
    T = b_tile * S
    n_bt = B // b_tile

    x2d = hidden_states.reshape(B * S, H)

    cos_hd, sin_hd = _rope_tables(S)                      # position_ids = arange(S)
    scale = 1.0 / math.sqrt(HEAD_DIM)
    cos_q, sin_q = _expand_tables(cos_hd, sin_hd, N_HEADS, b_tile, scale)
    cos_k, sin_k = _expand_tables(cos_hd, sin_hd, N_KV_HEADS, b_tile, 1.0)
    bias = _mask_bias(b_tile, S)

    grid_spec = pltpu.PrefetchScalarGridSpec(
        num_scalar_prefetch=0,
        # batch-tile outer (independent -> parallel), layer inner (residual carry)
        grid=(n_bt, N_LAYERS),
        in_specs=[
            pl.BlockSpec((T, H), lambda bt, l: (bt, 0)),                 # hidden tokens
            pl.BlockSpec((T, Q_DIM), lambda bt, l: (0, 0)),              # cos_q (scaled)
            pl.BlockSpec((T, Q_DIM), lambda bt, l: (0, 0)),              # sin_q (scaled)
            pl.BlockSpec((T, KV_DIM), lambda bt, l: (0, 0)),             # cos_k
            pl.BlockSpec((T, KV_DIM), lambda bt, l: (0, 0)),             # sin_k
            pl.BlockSpec((T, T), lambda bt, l: (0, 0)),                  # mask bias
            pl.BlockSpec((None, 1, H), lambda bt, l: (l, 0, 0)),         # input_layernorm
            pl.BlockSpec((None, H, PROJ_DIM), lambda bt, l: (l, 0, 0)),  # fused Wq|Wq_rh|Wk|Wk_rh|Wv
            pl.BlockSpec((None, H, H), lambda bt, l: (l, 0, 0)),         # Wo (fused)
            pl.BlockSpec((None, 1, H), lambda bt, l: (l, 0, 0)),         # post_attn norm
            pl.BlockSpec((None, H, 2 * INTERMEDIATE), lambda bt, l: (l, 0, 0)),  # Wgate|Wup
            pl.BlockSpec((None, INTERMEDIATE, H), lambda bt, l: (l, 0, 0)),      # Wdown
            pl.BlockSpec((1, H), lambda bt, l: (0, 0)),                  # final norm
            pl.BlockSpec((H, VOCAB), lambda bt, l: (0, 0)),              # lm_head
        ],
        out_specs=pl.BlockSpec((T, VOCAB), lambda bt, l: (bt, 0)),
        scratch_shapes=[pltpu.VMEM((T, H), jnp.float32)],                # residual stream
    )

    fused = pl.pallas_call(
        _second_half_kernel,
        out_shape=jax.ShapeDtypeStruct((B * S, VOCAB), jnp.float32),
        grid_spec=grid_spec,
        compiler_params=pltpu.CompilerParams(
            dimension_semantics=("parallel", "arbitrary")),
    )
    logits2d = fused(x2d, cos_q, sin_q, cos_k, sin_k, bias,
                     params["ln1"], params["wproj"], params["wo"],
                     params["ln2"], params["wgu"], params["wd"],
                     params["final_norm"], params["lm_head"])
    return logits2d.reshape(B, S, VOCAB)


def init_params(key):
    """Weights stacked over layers; matmul weights stored in bf16 (MXU inputs),
    norm weights kept in f32.  rotate_half is folded into extra Wq/Wk columns
    (it is position-independent), so the kernel never half-slices heads."""
    def lin(k, shape):
        return 0.02 * jax.random.normal(k, shape, dtype=jnp.float32)

    def rot_half_cols(w):
        w4 = w.reshape(N_LAYERS, HIDDEN, -1, HEAD_DIM)
        return jnp.concatenate([-w4[..., HALF:], w4[..., :HALF]], axis=-1).reshape(w.shape)

    keys = jax.random.split(key, 7)
    wq = lin(keys[0], (N_LAYERS, HIDDEN, Q_DIM))
    wk = lin(keys[1], (N_LAYERS, HIDDEN, KV_DIM))
    wv = lin(keys[2], (N_LAYERS, HIDDEN, KV_DIM))
    wproj = jnp.concatenate(
        [wq, rot_half_cols(wq), wk, rot_half_cols(wk), wv], axis=-1
    ).astype(jnp.bfloat16)

    return {
        "ln1": jnp.ones((N_LAYERS, 1, HIDDEN), jnp.float32),
        "ln2": jnp.ones((N_LAYERS, 1, HIDDEN), jnp.float32),
        "wproj": wproj,
        "wo": lin(keys[3], (N_LAYERS, HIDDEN, HIDDEN)).astype(jnp.bfloat16),
        "wgu": lin(keys[4], (N_LAYERS, HIDDEN, 2 * INTERMEDIATE)).astype(jnp.bfloat16),
        "wd": lin(keys[5], (N_LAYERS, INTERMEDIATE, HIDDEN)).astype(jnp.bfloat16),
        "final_norm": jnp.ones((1, HIDDEN), jnp.float32),
        "lm_head": lin(keys[6], (HIDDEN, VOCAB)).astype(jnp.bfloat16),
    }


# ----------------------------------- main -----------------------------------
if __name__ == "__main__":
    key = jax.random.PRNGKey(0)
    k_param, k_x = jax.random.split(key)

    params = init_params(k_param)
    B, S = 2, 8
    hidden_states = jax.random.normal(k_x, (B, S, HIDDEN), dtype=jnp.float32)

    logits = jax.jit(second_half_forward)(hidden_states, params)
    jax.block_until_ready(logits)

    assert logits.shape == (B, S, VOCAB)
    assert bool(jnp.all(jnp.isfinite(logits)))
    print("KERNEL_OK")
</pallas_src>

<mosaic_0001>
module attributes {stable_mosaic.version = 11 : i64} {
  func.func @_second_half_kernel(%arg0: i32, %arg1: i32, %arg2: memref<16x32xf32, #tpu.memory_space<vmem>>, %arg3: memref<16x32xf32, #tpu.memory_space<vmem>>, %arg4: memref<16x32xf32, #tpu.memory_space<vmem>>, %arg5: memref<16x16xf32, #tpu.memory_space<vmem>>, %arg6: memref<16x16xf32, #tpu.memory_space<vmem>>, %arg7: memref<16x16xf32, #tpu.memory_space<vmem>>, %arg8: memref<1x1x32xf32, #tpu.memory_space<vmem>>, %arg9: memref<1x32x112xbf16, #tpu.memory_space<vmem>>, %arg10: memref<1x32x32xbf16, #tpu.memory_space<vmem>>, %arg11: memref<1x1x32xf32, #tpu.memory_space<vmem>>, %arg12: memref<1x32x128xbf16, #tpu.memory_space<vmem>>, %arg13: memref<1x64x32xbf16, #tpu.memory_space<vmem>>, %arg14: memref<1x32xf32, #tpu.memory_space<vmem>>, %arg15: memref<32x128xbf16, #tpu.memory_space<vmem>>, %arg16: memref<16x128xf32, #tpu.memory_space<vmem>>, %arg17: memref<16x32xf32, #tpu.memory_space<vmem>>) attributes {dimension_semantics = [#tpu.dimension_semantics<parallel>, #tpu.dimension_semantics<arbitrary>], iteration_bounds = array<i64: 1, 2>, scalar_prefetch = 0 : i64, scratch_operands = 1 : i64, tpu.core_type = #tpu.core_type<tc>, window_params = [{transform_indices = @transform_0, window_bounds = array<i64: 16, 32>}, {pipeline_mode = #tpu.pipeline_mode<synchronous>, transform_indices = @transform_1, window_bounds = array<i64: 16, 32>}, {pipeline_mode = #tpu.pipeline_mode<synchronous>, transform_indices = @transform_2, window_bounds = array<i64: 16, 32>}, {pipeline_mode = #tpu.pipeline_mode<synchronous>, transform_indices = @transform_3, window_bounds = array<i64: 16, 16>}, {pipeline_mode = #tpu.pipeline_mode<synchronous>, transform_indices = @transform_4, window_bounds = array<i64: 16, 16>}, {pipeline_mode = #tpu.pipeline_mode<synchronous>, transform_indices = @transform_5, window_bounds = array<i64: 16, 16>}, {transform_indices = @transform_6, window_bounds = array<i64: 1, 1, 32>}, {transform_indices = @transform_7, window_bounds = array<i64: 1, 32, 112>}, {transform_indices = @transform_8, window_bounds = array<i64: 1, 32, 32>}, {transform_indices = @transform_9, window_bounds = array<i64: 1, 1, 32>}, {transform_indices = @transform_10, window_bounds = array<i64: 1, 32, 128>}, {transform_indices = @transform_11, window_bounds = array<i64: 1, 64, 32>}, {pipeline_mode = #tpu.pipeline_mode<synchronous>, transform_indices = @transform_12, window_bounds = array<i64: 1, 32>}, {pipeline_mode = #tpu.pipeline_mode<synchronous>, transform_indices = @transform_13, window_bounds = array<i64: 32, 128>}, {transform_indices = @transform_14, window_bounds = array<i64: 16, 128>}]} {
    %c0_i32 = arith.constant 0 : i32
    %0 = arith.cmpi eq, %arg1, %c0_i32 : i32
    %1 = arith.extui %0 : i1 to i32
    %c0_i32_0 = arith.constant 0 : i32
    %2 = arith.cmpi ne, %1, %c0_i32_0 : i32
    scf.if %2 {
      %c0_60 = arith.constant 0 : index
      %c0_61 = arith.constant 0 : index
      %161 = vector.load %arg2[%c0_60, %c0_61] : memref<16x32xf32, #tpu.memory_space<vmem>>, vector<16x32xf32>
      %c0_62 = arith.constant 0 : index
      %c0_63 = arith.constant 0 : index
      %162 = vector.load %arg17[%c0_62, %c0_63] : memref<16x32xf32, #tpu.memory_space<vmem>>, vector<16x32xf32>
      tpu.vector_store %arg17[%c0_62, %c0_63], %161 {strides = array<i32>} : memref<16x32xf32, #tpu.memory_space<vmem>>, vector<16x32xf32>,
    } else {
    }
    %c0 = arith.constant 0 : index
    %c0_1 = arith.constant 0 : index
    %3 = vector.load %arg17[%c0, %c0_1] : memref<16x32xf32, #tpu.memory_space<vmem>>, vector<16x32xf32>
    %c0_2 = arith.constant 0 : index
    %c0_3 = arith.constant 0 : index
    %c0_4 = arith.constant 0 : index
    %4 = vector.load %arg8[%c0_2, %c0_3, %c0_4] : memref<1x1x32xf32, #tpu.memory_space<vmem>>, vector<1x1x32xf32>
    %5 = vector.shape_cast %4 : vector<1x1x32xf32> to vector<1x32xf32>
    %6 = arith.mulf %3, %3 : vector<16x32xf32>
    %cst = arith.constant dense<0.000000e+00> : vector<16xf32>
    %7 = vector.multi_reduction <add>, %6, %cst [1] : vector<16x32xf32> to vector<16xf32>
    %8 = vector.shape_cast %7 : vector<16xf32> to vector<16x1xf32>
    %cst_5 = arith.constant 3.200000e+01 : f32
    %9 = vector.broadcast %cst_5 : f32 to vector<16x1xf32>
    %10 = arith.divf %8, %9 : vector<16x1xf32>
    %cst_6 = arith.constant 9.99999974E-6 : f32
    %11 = vector.broadcast %cst_6 : f32 to vector<16x1xf32>
    %12 = arith.addf %10, %11 : vector<16x1xf32>
    %13 = math.rsqrt %12 : vector<16x1xf32>
    %14 = vector.broadcast %13 : vector<16x1xf32> to vector<16x32xf32>
    %15 = arith.mulf %3, %14 : vector<16x32xf32>
    %16 = vector.broadcast %5 : vector<1x32xf32> to vector<16x32xf32>
    %17 = arith.mulf %15, %16 : vector<16x32xf32>
    %c0_7 = arith.constant 0 : index
    %c0_8 = arith.constant 0 : index
    %c0_9 = arith.constant 0 : index
    %18 = vector.load %arg9[%c0_7, %c0_8, %c0_9] : memref<1x32x112xbf16, #tpu.memory_space<vmem>>, vector<1x32x112xbf16>
    %19 = vector.shape_cast %18 : vector<1x32x112xbf16> to vector<32x112xbf16>
    %20 = arith.truncf %17 : vector<16x32xf32> to vector<16x32xbf16>
    %cst_10 = arith.constant dense<0.000000e+00> : vector<16x112xf32>
    %21 = tpu.matmul %20, %19, %cst_10 {dimension_numbers = #tpu.dot_dimension_numbers<[1], [0], [0], [1], [0, 0, 1, 1], [], []>} : vector<16x32xbf16>, vector<32x112xbf16>, vector<16x112xf32> -> vector<16x112xf32>
    %22 = vector.extract_strided_slice %21 {offsets = [0, 0], sizes = [16, 32], strides = [1, 1]} : vector<16x112xf32> to vector<16x32xf32>
    %23 = vector.extract_strided_slice %21 {offsets = [0, 32], sizes = [16, 32], strides = [1, 1]} : vector<16x112xf32> to vector<16x32xf32>
    %24 = vector.extract_strided_slice %21 {offsets = [0, 64], sizes = [16, 16], strides = [1, 1]} : vector<16x112xf32> to vector<16x16xf32>
    %25 = vector.extract_strided_slice %21 {offsets = [0, 80], sizes = [16, 16], strides = [1, 1]} : vector<16x112xf32> to vector<16x16xf32>
    %26 = vector.extract_strided_slice %21 {offsets = [0, 96], sizes = [16, 16], strides = [1, 1]} : vector<16x112xf32> to vector<16x16xf32>
    %c0_11 = arith.constant 0 : index
    %c0_12 = arith.constant 0 : index
    %27 = vector.load %arg3[%c0_11, %c0_12] : memref<16x32xf32, #tpu.memory_space<vmem>>, vector<16x32xf32>
    %28 = arith.mulf %22, %27 : vector<16x32xf32>
    %c0_13 = arith.constant 0 : index
    %c0_14 = arith.constant 0 : index
    %29 = vector.load %arg4[%c0_13, %c0_14] : memref<16x32xf32, #tpu.memory_space<vmem>>, vector<16x32xf32>
    %30 = arith.mulf %23, %29 : vector<16x32xf32>
    %31 = arith.addf %28, %30 : vector<16x32xf32>
    %c0_15 = arith.constant 0 : index
    %c0_16 = arith.constant 0 : index
    %32 = vector.load %arg5[%c0_15, %c0_16] : memref<16x16xf32, #tpu.memory_space<vmem>>, vector<16x16xf32>
    %33 = arith.mulf %24, %32 : vector<16x16xf32>
    %c0_17 = arith.constant 0 : index
    %c0_18 = arith.constant 0 : index
    %34 = vector.load %arg6[%c0_17, %c0_18] : memref<16x16xf32, #tpu.memory_space<vmem>>, vector<16x16xf32>
    %35 = arith.mulf %25, %34 : vector<16x16xf32>
    %36 = arith.addf %33, %35 : vector<16x16xf32>
    %c0_19 = arith.constant 0 : index
    %c0_20 = arith.constant 0 : index
    %37 = vector.load %arg7[%c0_19, %c0_20] : memref<16x16xf32, #tpu.memory_space<vmem>>, vector<16x16xf32>
    %38 = vector.extract_strided_slice %31 {offsets = [0, 0], sizes = [16, 8], strides = [1, 1]} : vector<16x32xf32> to vector<16x8xf32>
    %39 = vector.extract_strided_slice %36 {offsets = [0, 0], sizes = [16, 8], strides = [1, 1]} : vector<16x16xf32> to vector<16x8xf32>
    %40 = vector.extract_strided_slice %26 {offsets = [0, 0], sizes = [16, 8], strides = [1, 1]} : vector<16x16xf32> to vector<16x8xf32>
    %41 = arith.truncf %38 : vector<16x8xf32> to vector<16x8xbf16>
    %42 = arith.truncf %39 : vector<16x8xf32> to vector<16x8xbf16>
    %cst_21 = arith.constant dense<0.000000e+00> : vector<16x16xf32>
    %43 = tpu.matmul %41, %42, %cst_21 {dimension_numbers = #tpu.dot_dimension_numbers<[1], [1], [0], [0], [0, 0, 1, 0], [], []>} : vector<16x8xbf16>, vector<16x8xbf16>, vector<16x16xf32> -> vector<16x16xf32>
    %44 = arith.addf %43, %37 : vector<16x16xf32>
    %cst_22 = arith.constant dense<0xFF800000> : vector<16xf32>
    %45 = vector.multi_reduction <maximumf>, %44, %cst_22 [1] : vector<16x16xf32> to vector<16xf32>
    %46 = vector.shape_cast %45 : vector<16xf32> to vector<16x1xf32>
    %47 = vector.broadcast %46 : vector<16x1xf32> to vector<16x16xf32>
    %48 = arith.subf %44, %47 : vector<16x16xf32>
    %49 = math.exp %48 : vector<16x16xf32>
    %cst_23 = arith.constant dense<0.000000e+00> : vector<16xf32>
    %50 = vector.multi_reduction <add>, %49, %cst_23 [1] : vector<16x16xf32> to vector<16xf32>
    %51 = vector.shape_cast %50 : vector<16xf32> to vector<16x1xf32>
    %52 = tpu.reciprocal %51 {approx = true} : vector<16x1xf32> -> vector<16x1xf32>
    %53 = vector.broadcast %52 : vector<16x1xf32> to vector<16x16xf32>
    %54 = arith.mulf %49, %53 : vector<16x16xf32>
    %55 = arith.truncf %54 : vector<16x16xf32> to vector<16x16xbf16>
    %56 = arith.truncf %40 : vector<16x8xf32> to vector<16x8xbf16>
    %cst_24 = arith.constant dense<0.000000e+00> : vector<16x8xf32>
    %57 = tpu.matmul %55, %56, %cst_24 {dimension_numbers = #tpu.dot_dimension_numbers<[1], [0], [0], [1], [0, 0, 1, 1], [], []>} : vector<16x16xbf16>, vector<16x8xbf16>, vector<16x8xf32> -> vector<16x8xf32>
    %58 = vector.extract_strided_slice %31 {offsets = [0, 8], sizes = [16, 8], strides = [1, 1]} : vector<16x32xf32> to vector<16x8xf32>
    %59 = vector.extract_strided_slice %36 {offsets = [0, 0], sizes = [16, 8], strides = [1, 1]} : vector<16x16xf32> to vector<16x8xf32>
    %60 = vector.extract_strided_slice %26 {offsets = [0, 0], sizes = [16, 8], strides = [1, 1]} : vector<16x16xf32> to vector<16x8xf32>
    %61 = arith.truncf %58 : vector<16x8xf32> to vector<16x8xbf16>
    %62 = arith.truncf %59 : vector<16x8xf32> to vector<16x8xbf16>
    %cst_25 = arith.constant dense<0.000000e+00> : vector<16x16xf32>
    %63 = tpu.matmul %61, %62, %cst_25 {dimension_numbers = #tpu.dot_dimension_numbers<[1], [1], [0], [0], [0, 0, 1, 0], [], []>} : vector<16x8xbf16>, vector<16x8xbf16>, vector<16x16xf32> -> vector<16x16xf32>
    %64 = arith.addf %63, %37 : vector<16x16xf32>
    %cst_26 = arith.constant dense<0xFF800000> : vector<16xf32>
    %65 = vector.multi_reduction <maximumf>, %64, %cst_26 [1] : vector<16x16xf32> to vector<16xf32>
    %66 = vector.shape_cast %65 : vector<16xf32> to vector<16x1xf32>
    %67 = vector.broadcast %66 : vector<16x1xf32> to vector<16x16xf32>
    %68 = arith.subf %64, %67 : vector<16x16xf32>
    %69 = math.exp %68 : vector<16x16xf32>
    %cst_27 = arith.constant dense<0.000000e+00> : vector<16xf32>
    %70 = vector.multi_reduction <add>, %69, %cst_27 [1] : vector<16x16xf32> to vector<16xf32>
    %71 = vector.shape_cast %70 : vector<16xf32> to vector<16x1xf32>
    %72 = tpu.reciprocal %71 {approx = true} : vector<16x1xf32> -> vector<16x1xf32>
    %73 = vector.broadcast %72 : vector<16x1xf32> to vector<16x16xf32>
    %74 = arith.mulf %69, %73 : vector<16x16xf32>
    %75 = arith.truncf %74 : vector<16x16xf32> to vector<16x16xbf16>
    %76 = arith.truncf %60 : vector<16x8xf32> to vector<16x8xbf16>
    %cst_28 = arith.constant dense<0.000000e+00> : vector<16x8xf32>
    %77 = tpu.matmul %75, %76, %cst_28 {dimension_numbers = #tpu.dot_dimension_numbers<[1], [0], [0], [1], [0, 0, 1, 1], [], []>} : vector<16x16xbf16>, vector<16x8xbf16>, vector<16x8xf32> -> vector<16x8xf32>
    %78 = vector.extract_strided_slice %31 {offsets = [0, 16], sizes = [16, 8], strides = [1, 1]} : vector<16x32xf32> to vector<16x8xf32>
    %79 = vector.extract_strided_slice %36 {offsets = [0, 8], sizes = [16, 8], strides = [1, 1]} : vector<16x16xf32> to vector<16x8xf32>
    %80 = vector.extract_strided_slice %26 {offsets = [0, 8], sizes = [16, 8], strides = [1, 1]} : vector<16x16xf32> to vector<16x8xf32>
    %81 = arith.truncf %78 : vector<16x8xf32> to vector<16x8xbf16>
    %82 = arith.truncf %79 : vector<16x8xf32> to vector<16x8xbf16>
    %cst_29 = arith.constant dense<0.000000e+00> : vector<16x16xf32>
    %83 = tpu.matmul %81, %82, %cst_29 {dimension_numbers = #tpu.dot_dimension_numbers<[1], [1], [0], [0], [0, 0, 1, 0], [], []>} : vector<16x8xbf16>, vector<16x8xbf16>, vector<16x16xf32> -> vector<16x16xf32>
    %84 = arith.addf %83, %37 : vector<16x16xf32>
    %cst_30 = arith.constant dense<0xFF800000> : vector<16xf32>
    %85 = vector.multi_reduction <maximumf>, %84, %cst_30 [1] : vector<16x16xf32> to vector<16xf32>
    %86 = vector.shape_cast %85 : vector<16xf32> to vector<16x1xf32>
    %87 = vector.broadcast %86 : vector<16x1xf32> to vector<16x16xf32>
    %88 = arith.subf %84, %87 : vector<16x16xf32>
    %89 = math.exp %88 : vector<16x16xf32>
    %cst_31 = arith.constant dense<0.000000e+00> : vector<16xf32>
    %90 = vector.multi_reduction <add>, %89, %cst_31 [1] : vector<16x16xf32> to vector<16xf32>
    %91 = vector.shape_cast %90 : vector<16xf32> to vector<16x1xf32>
    %92 = tpu.reciprocal %91 {approx = true} : vector<16x1xf32> -> vector<16x1xf32>
    %93 = vector.broadcast %92 : vector<16x1xf32> to vector<16x16xf32>
    %94 = arith.mulf %89, %93 : vector<16x16xf32>
    %95 = arith.truncf %94 : vector<16x16xf32> to vector<16x16xbf16>
    %96 = arith.truncf %80 : vector<16x8xf32> to vector<16x8xbf16>
    %cst_32 = arith.constant dense<0.000000e+00> : vector<16x8xf32>
    %97 = tpu.matmul %95, %96, %cst_32 {dimension_numbers = #tpu.dot_dimension_numbers<[1], [0], [0], [1], [0, 0, 1, 1], [], []>} : vector<16x16xbf16>, vector<16x8xbf16>, vector<16x8xf32> -> vector<16x8xf32>
    %98 = vector.extract_strided_slice %31 {offsets = [0, 24], sizes = [16, 8], strides = [1, 1]} : vector<16x32xf32> to vector<16x8xf32>
    %99 = vector.extract_strided_slice %36 {offsets = [0, 8], sizes = [16, 8], strides = [1, 1]} : vector<16x16xf32> to vector<16x8xf32>
    %100 = vector.extract_strided_slice %26 {offsets = [0, 8], sizes = [16, 8], strides = [1, 1]} : vector<16x16xf32> to vector<16x8xf32>
    %101 = arith.truncf %98 : vector<16x8xf32> to vector<16x8xbf16>
    %102 = arith.truncf %99 : vector<16x8xf32> to vector<16x8xbf16>
    %cst_33 = arith.constant dense<0.000000e+00> : vector<16x16xf32>
    %103 = tpu.matmul %101, %102, %cst_33 {dimension_numbers = #tpu.dot_dimension_numbers<[1], [1], [0], [0], [0, 0, 1, 0], [], []>} : vector<16x8xbf16>, vector<16x8xbf16>, vector<16x16xf32> -> vector<16x16xf32>
    %104 = arith.addf %103, %37 : vector<16x16xf32>
    %cst_34 = arith.constant dense<0xFF800000> : vector<16xf32>
    %105 = vector.multi_reduction <maximumf>, %104, %cst_34 [1] : vector<16x16xf32> to vector<16xf32>
    %106 = vector.shape_cast %105 : vector<16xf32> to vector<16x1xf32>
    %107 = vector.broadcast %106 : vector<16x1xf32> to vector<16x16xf32>
    %108 = arith.subf %104, %107 : vector<16x16xf32>
    %109 = math.exp %108 : vector<16x16xf32>
    %cst_35 = arith.constant dense<0.000000e+00> : vector<16xf32>
    %110 = vector.multi_reduction <add>, %109, %cst_35 [1] : vector<16x16xf32> to vector<16xf32>
    %111 = vector.shape_cast %110 : vector<16xf32> to vector<16x1xf32>
    %112 = tpu.reciprocal %111 {approx = true} : vector<16x1xf32> -> vector<16x1xf32>
    %113 = vector.broadcast %112 : vector<16x1xf32> to vector<16x16xf32>
    %114 = arith.mulf %109, %113 : vector<16x16xf32>
    %115 = arith.truncf %114 : vector<16x16xf32> to vector<16x16xbf16>
    %116 = arith.truncf %100 : vector<16x8xf32> to vector<16x8xbf16>
    %cst_36 = arith.constant dense<0.000000e+00> : vector<16x8xf32>
    %117 = tpu.matmul %115, %116, %cst_36 {dimension_numbers = #tpu.dot_dimension_numbers<[1], [0], [0], [1], [0, 0, 1, 1], [], []>} : vector<16x16xbf16>, vector<16x8xbf16>, vector<16x8xf32> -> vector<16x8xf32>
    %118 = tpu.concatenate %57, %77, %97, %117 in 1 : vector<16x8xf32>, vector<16x8xf32>, vector<16x8xf32>, vector<16x8xf32> -> vector<16x32xf32>
    %c0_37 = arith.constant 0 : index
    %c0_38 = arith.constant 0 : index
    %c0_39 = arith.constant 0 : index
    %119 = vector.load %arg10[%c0_37, %c0_38, %c0_39] : memref<1x32x32xbf16, #tpu.memory_space<vmem>>, vector<1x32x32xbf16>
    %120 = vector.shape_cast %119 : vector<1x32x32xbf16> to vector<32x32xbf16>
    %121 = arith.truncf %118 : vector<16x32xf32> to vector<16x32xbf16>
    %cst_40 = arith.constant dense<0.000000e+00> : vector<16x32xf32>
    %122 = tpu.matmul %121, %120, %cst_40 {dimension_numbers = #tpu.dot_dimension_numbers<[1], [0], [0], [1], [0, 0, 1, 1], [], []>} : vector<16x32xbf16>, vector<32x32xbf16>, vector<16x32xf32> -> vector<16x32xf32>
    %123 = arith.addf %3, %122 : vector<16x32xf32>
    %c0_41 = arith.constant 0 : index
    %c0_42 = arith.constant 0 : index
    %c0_43 = arith.constant 0 : index
    %124 = vector.load %arg11[%c0_41, %c0_42, %c0_43] : memref<1x1x32xf32, #tpu.memory_space<vmem>>, vector<1x1x32xf32>
    %125 = vector.shape_cast %124 : vector<1x1x32xf32> to vector<1x32xf32>
    %126 = arith.mulf %123, %123 : vector<16x32xf32>
    %cst_44 = arith.constant dense<0.000000e+00> : vector<16xf32>
    %127 = vector.multi_reduction <add>, %126, %cst_44 [1] : vector<16x32xf32> to vector<16xf32>
    %128 = vector.shape_cast %127 : vector<16xf32> to vector<16x1xf32>
    %cst_45 = arith.constant 3.200000e+01 : f32
    %129 = vector.broadcast %cst_45 : f32 to vector<16x1xf32>
    %130 = arith.divf %128, %129 : vector<16x1xf32>
    %cst_46 = arith.constant 9.99999974E-6 : f32
    %131 = vector.broadcast %cst_46 : f32 to vector<16x1xf32>
    %132 = arith.addf %130, %131 : vector<16x1xf32>
    %133 = math.rsqrt %132 : vector<16x1xf32>
    %134 = vector.broadcast %133 : vector<16x1xf32> to vector<16x32xf32>
    %135 = arith.mulf %123, %134 : vector<16x32xf32>
    %136 = vector.broadcast %125 : vector<1x32xf32> to vector<16x32xf32>
    %137 = arith.mulf %135, %136 : vector<16x32xf32>
    %c0_47 = arith.constant 0 : index
    %c0_48 = arith.constant 0 : index
    %c0_49 = arith.constant 0 : index
    %138 = vector.load %arg12[%c0_47, %c0_48, %c0_49] : memref<1x32x128xbf16, #tpu.memory_space<vmem>>, vector<1x32x128xbf16>
    %139 = vector.shape_cast %138 : vector<1x32x128xbf16> to vector<32x128xbf16>
    %140 = arith.truncf %137 : vector<16x32xf32> to vector<16x32xbf16>
    %cst_50 = arith.constant dense<0.000000e+00> : vector<16x128xf32>
    %141 = tpu.matmul %140, %139, %cst_50 {dimension_numbers = #tpu.dot_dimension_numbers<[1], [0], [0], [1], [0, 0, 1, 1], [], []>} : vector<16x32xbf16>, vector<32x128xbf16>, vector<16x128xf32> -> vector<16x128xf32>
    %142 = vector.extract_strided_slice %141 {offsets = [0, 0], sizes = [16, 64], strides = [1, 1]} : vector<16x128xf32> to vector<16x64xf32>
    %143 = vector.extract_strided_slice %141 {offsets = [0, 64], sizes = [16, 64], strides = [1, 1]} : vector<16x128xf32> to vector<16x64xf32>
    %cst_51 = arith.constant 0.000000e+00 : f32
    %144 = vector.broadcast %cst_51 : f32 to vector<16x64xf32>
    %145 = arith.subf %144, %142 : vector<16x64xf32>
    %146 = math.exp %145 : vector<16x64xf32>
    %cst_52 = arith.constant 1.000000e+00 : f32
    %147 = vector.broadcast %cst_52 : f32 to vector<16x64xf32>
    %148 = arith.addf %147, %146 : vector<16x64xf32>
    %149 = tpu.reciprocal %148 {approx = true} : vector<16x64xf32> -> vector<16x64xf32>
    %150 = arith.mulf %142, %149 : vector<16x64xf32>
    %151 = arith.mulf %150, %143 : vector<16x64xf32>
    %c0_53 = arith.constant 0 : index
    %c0_54 = arith.constant 0 : index
    %c0_55 = arith.constant 0 : index
    %152 = vector.load %arg13[%c0_53, %c0_54, %c0_55] : memref<1x64x32xbf16, #tpu.memory_space<vmem>>, vector<1x64x32xbf16>
    %153 = vector.shape_cast %152 : vector<1x64x32xbf16> to vector<64x32xbf16>
    %154 = arith.truncf %151 : vector<16x64xf32> to vector<16x64xbf16>
    %cst_56 = arith.constant dense<0.000000e+00> : vector<16x32xf32>
    %155 = tpu.matmul %154, %153, %cst_56 {dimension_numbers = #tpu.dot_dimension_numbers<[1], [0], [0], [1], [0, 0, 1, 1], [], []>} : vector<16x64xbf16>, vector<64x32xbf16>, vector<16x32xf32> -> vector<16x32xf32>
    %156 = arith.addf %123, %155 : vector<16x32xf32>
    %c0_57 = arith.constant 0 : index
    %c0_58 = arith.constant 0 : index
    %157 = vector.load %arg17[%c0_57, %c0_58] : memref<16x32xf32, #tpu.memory_space<vmem>>, vector<16x32xf32>
    tpu.vector_store %arg17[%c0_57, %c0_58], %156 {strides = array<i32>} : memref<16x32xf32, #tpu.memory_space<vmem>>, vector<16x32xf32>,
    %c1_i32 = arith.constant 1 : i32
    %158 = arith.cmpi eq, %arg1, %c1_i32 : i32
    %159 = arith.extui %158 : i1 to i32
    %c0_i32_59 = arith.constant 0 : i32
    %160 = arith.cmpi ne, %159, %c0_i32_59 : i32
    scf.if %160 {
      %c0_60 = arith.constant 0 : index
      %c0_61 = arith.constant 0 : index
      %161 = vector.load %arg14[%c0_60, %c0_61] : memref<1x32xf32, #tpu.memory_space<vmem>>, vector<1x32xf32>
      %162 = arith.mulf %156, %156 : vector<16x32xf32>
      %cst_62 = arith.constant dense<0.000000e+00> : vector<16xf32>
      %163 = vector.multi_reduction <add>, %162, %cst_62 [1] : vector<16x32xf32> to vector<16xf32>
      %164 = vector.shape_cast %163 : vector<16xf32> to vector<16x1xf32>
      %cst_63 = arith.constant 3.200000e+01 : f32
      %165 = vector.broadcast %cst_63 : f32 to vector<16x1xf32>
      %166 = arith.divf %164, %165 : vector<16x1xf32>
      %cst_64 = arith.constant 9.99999974E-6 : f32
      %167 = vector.broadcast %cst_64 : f32 to vector<16x1xf32>
      %168 = arith.addf %166, %167 : vector<16x1xf32>
      %169 = math.rsqrt %168 : vector<16x1xf32>
      %170 = vector.broadcast %169 : vector<16x1xf32> to vector<16x32xf32>
      %171 = arith.mulf %156, %170 : vector<16x32xf32>
      %172 = vector.broadcast %161 : vector<1x32xf32> to vector<16x32xf32>
      %173 = arith.mulf %171, %172 : vector<16x32xf32>
      %c0_65 = arith.constant 0 : index
      %c0_66 = arith.constant 0 : index
      %174 = vector.load %arg15[%c0_65, %c0_66] : memref<32x128xbf16, #tpu.memory_space<vmem>>, vector<32x128xbf16>
      %175 = arith.truncf %173 : vector<16x32xf32> to vector<16x32xbf16>
      %cst_67 = arith.constant dense<0.000000e+00> : vector<16x128xf32>
      %176 = tpu.matmul %175, %174, %cst_67 {dimension_numbers = #tpu.dot_dimension_numbers<[1], [0], [0], [1], [0, 0, 1, 1], [], []>} : vector<16x32xbf16>, vector<32x128xbf16>, vector<16x128xf32> -> vector<16x128xf32>
      %c0_68 = arith.constant 0 : index
      %c0_69 = arith.constant 0 : index
      %177 = vector.load %arg16[%c0_68, %c0_69] : memref<16x128xf32, #tpu.memory_space<vmem>>, vector<16x128xf32>
      tpu.vector_store %arg16[%c0_68, %c0_69], %176 {strides = array<i32>} : memref<16x128xf32, #tpu.memory_space<vmem>>, vector<16x128xf32>,
    } else {
    }
    return
  }
  func.func @transform_0(%arg0: i32, %arg1: i32) -> (i32, i32) {
    %c0_i32 = arith.constant 0 : i32
    %c0_i32_0 = arith.constant 0 : i32
    return %arg0, %c0_i32 : i32, i32
  }
  func.func @transform_1(%arg0: i32, %arg1: i32) -> (i32, i32) {
    %c0_i32 = arith.constant 0 : i32
    %c0_i32_0 = arith.constant 0 : i32
    %c0_i32_1 = arith.constant 0 : i32
    return %c0_i32, %c0_i32_0 : i32, i32
  }
  func.func @transform_2(%arg0: i32, %arg1: i32) -> (i32, i32) {
    %c0_i32 = arith.constant 0 : i32
    %c0_i32_0 = arith.constant 0 : i32
    %c0_i32_1 = arith.constant 0 : i32
    return %c0_i32, %c0_i32_0 : i32, i32
  }
  func.func @transform_3(%arg0: i32, %arg1: i32) -> (i32, i32) {
    %c0_i32 = arith.constant 0 : i32
    %c0_i32_0 = arith.constant 0 : i32
    %c0_i32_1 = arith.constant 0 : i32
    return %c0_i32, %c0_i32_0 : i32, i32
  }
  func.func @transform_4(%arg0: i32, %arg1: i32) -> (i32, i32) {
    %c0_i32 = arith.constant 0 : i32
    %c0_i32_0 = arith.constant 0 : i32
    %c0_i32_1 = arith.constant 0 : i32
    return %c0_i32, %c0_i32_0 : i32, i32
  }
  func.func @transform_5(%arg0: i32, %arg1: i32) -> (i32, i32) {
    %c0_i32 = arith.constant 0 : i32
    %c0_i32_0 = arith.constant 0 : i32
    %c0_i32_1 = arith.constant 0 : i32
    return %c0_i32, %c0_i32_0 : i32, i32
  }
  func.func @transform_6(%arg0: i32, %arg1: i32) -> (i32, i32, i32) {
    %c0_i32 = arith.constant 0 : i32
    %c0_i32_0 = arith.constant 0 : i32
    %c0_i32_1 = arith.constant 0 : i32
    return %arg1, %c0_i32, %c0_i32_0 : i32, i32, i32
  }
  func.func @transform_7(%arg0: i32, %arg1: i32) -> (i32, i32, i32) {
    %c0_i32 = arith.constant 0 : i32
    %c0_i32_0 = arith.constant 0 : i32
    %c0_i32_1 = arith.constant 0 : i32
    return %arg1, %c0_i32, %c0_i32_0 : i32, i32, i32
  }
  func.func @transform_8(%arg0: i32, %arg1: i32) -> (i32, i32, i32) {
    %c0_i32 = arith.constant 0 : i32
    %c0_i32_0 = arith.constant 0 : i32
    %c0_i32_1 = arith.constant 0 : i32
    return %arg1, %c0_i32, %c0_i32_0 : i32, i32, i32
  }
  func.func @transform_9(%arg0: i32, %arg1: i32) -> (i32, i32, i32) {
    %c0_i32 = arith.constant 0 : i32
    %c0_i32_0 = arith.constant 0 : i32
    %c0_i32_1 = arith.constant 0 : i32
    return %arg1, %c0_i32, %c0_i32_0 : i32, i32, i32
  }
  func.func @transform_10(%arg0: i32, %arg1: i32) -> (i32, i32, i32) {
    %c0_i32 = arith.constant 0 : i32
    %c0_i32_0 = arith.constant 0 : i32
    %c0_i32_1 = arith.constant 0 : i32
    return %arg1, %c0_i32, %c0_i32_0 : i32, i32, i32
  }
  func.func @transform_11(%arg0: i32, %arg1: i32) -> (i32, i32, i32) {
    %c0_i32 = arith.constant 0 : i32
    %c0_i32_0 = arith.constant 0 : i32
    %c0_i32_1 = arith.constant 0 : i32
    return %arg1, %c0_i32, %c0_i32_0 : i32, i32, i32
  }
  func.func @transform_12(%arg0: i32, %arg1: i32) -> (i32, i32) {
    %c0_i32 = arith.constant 0 : i32
    %c0_i32_0 = arith.constant 0 : i32
    %c0_i32_1 = arith.constant 0 : i32
    return %c0_i32, %c0_i32_0 : i32, i32
  }
  func.func @transform_13(%arg0: i32, %arg1: i32) -> (i32, i32) {
    %c0_i32 = arith.constant 0 : i32
    %c0_i32_0 = arith.constant 0 : i32
    %c0_i32_1 = arith.constant 0 : i32
    return %c0_i32, %c0_i32_0 : i32, i32
  }
  func.func @transform_14(%arg0: i32, %arg1: i32) -> (i32, i32) {
    %c0_i32 = arith.constant 0 : i32
    %c0_i32_0 = arith.constant 0 : i32
    return %arg0, %c0_i32 : i32, i32
  }
}

</mosaic_0001>

<bundles_post_ra>
// kernel: tile.33
= control target key start
LH: loop header
LB: loop body
LE: loop exit
PB: predicated region body
PF: predicated region fallthrough
CT: control target
= control target key end

     0   :  { %s154_s0 = inlined_call_operand.vmem [shape: f32[8,8], index: 0, kind: input, shape index: {}]   ;;  %s155_s1 = inlined_call_operand.vmem [shape: f32[2,8,2,8], index: 1, kind: output, shape index: {}]  }
   0x1   :  { %v4_v0 = vld [vmem:[%s154_s0] ss:$0 sm:$0xff]  ;;  %v51_v1 = vld [vmem:[%s154_s0 + $0x1] ss:$0 sm:$0xff]  ;;  %v54_v2 = vld [vmem:[%s154_s0 + $0x2] ss:$0 sm:$0xff] }
   0x2   :  { %5 = vst [vmem:[%s155_s1] sm:$0x3] %v4_v0  ;;  %50 = vst [vmem:[%s155_s1 + $0x10] sm:$0x3] %v4_v0  ;;  %v57_v3 = vld [vmem:[%s154_s0 + $0x3] ss:$0 sm:$0xff] }
   0x3   :  { %52 = vst [vmem:[%s155_s1 + $0x2] sm:$0x3] %v51_v1  ;;  %53 = vst [vmem:[%s155_s1 + $0x12] sm:$0x3] %v51_v1  ;;  %v60_v4 = vld [vmem:[%s154_s0 + $0x4] ss:$0 sm:$0xff] }
   0x4   :  { %55 = vst [vmem:[%s155_s1 + $0x4] sm:$0x3] %v54_v2  ;;  %56 = vst [vmem:[%s155_s1 + $0x14] sm:$0x3] %v54_v2  ;;  %v63_v5 = vld [vmem:[%s154_s0 + $0x5] ss:$0 sm:$0xff] }
   0x5   :  { %58 = vst [vmem:[%s155_s1 + $0x6] sm:$0x3] %v57_v3  ;;  %59 = vst [vmem:[%s155_s1 + $0x16] sm:$0x3] %v57_v3  ;;  %v66_v6 = vld [vmem:[%s154_s0 + $0x6] ss:$0 sm:$0xff] }
   0x6   :  { %61 = vst [vmem:[%s155_s1 + $0x8] sm:$0x3] %v60_v4  ;;  %62 = vst [vmem:[%s155_s1 + $0x18] sm:$0x3] %v60_v4  ;;  %v69_v7 = vld [vmem:[%s154_s0 + $0x7] ss:$0 sm:$0xff] }
   0x7   :  { %64 = vst [vmem:[%s155_s1 + $0xa] sm:$0x3] %v63_v5  ;;  %65 = vst [vmem:[%s155_s1 + $0x1a] sm:$0x3] %v63_v5 }
   0x8   :  { %67 = vst [vmem:[%s155_s1 + $0xc] sm:$0x3] %v66_v6  ;;  %68 = vst [vmem:[%s155_s1 + $0x1c] sm:$0x3] %v66_v6 }
   0x9   :  { %70 = vst [vmem:[%s155_s1 + $0xe] sm:$0x3] %v69_v7  ;;  %71 = vst [vmem:[%s155_s1 + $0x1e] sm:$0x3] %v69_v7 }

// kernel: tile.34
= control target key start
LH: loop header
LB: loop body
LE: loop exit
PB: predicated region body
PF: predicated region fallthrough
CT: control target
= control target key end

     0   :  { %vm82_vm0 = vcmask 1047556   ;;  %vm84_vm1 = vcmask 64512   ;;  %vm103_vm2 = vcmask 130112   ;;  %s225_s0 = inlined_call_operand.vmem [shape: f32[2,8,2,8], index: 0, kind: input, shape index: {}]   ;;  %s226_s1 = inlined_call_operand.vmem [shape: f32[16,16], index: 1, kind: output, shape index: {}]  }
   0x1   :  { %v138_v0 = vld [vmem:[%s225_s0 + $0xe] sm:$0x3]  ;;  %v139_v1 = vld [vmem:[%s225_s0 + $0xc] sm:$0x3]  ;;  %v140_v2 = vld [vmem:[%s225_s0 + $0xa] sm:$0x3] }
   0x2   :  { %48 = vst [vmem:[#allocation0 + $0x38] sm:$0x3] %v138_v0  ;;  %53 = vst [vmem:[#allocation0 + $0x30] sm:$0x3] %v139_v1  ;;  %v141_v3 = vld [vmem:[%s225_s0 + $0x8] sm:$0x3] }
   0x3   :  { %58 = vst [vmem:[#allocation0 + $0x28] sm:$0x3] %v140_v2  ;;  %v142_v4 = vld [vmem:[%s225_s0 + $0x6] sm:$0x3]  ;;  %v143_v5 = vld [vmem:[%s225_s0 + $0x4] sm:$0x3] }
   0x4   :  { %63 = vst [vmem:[#allocation0 + $0x20] sm:$0x3] %v141_v3  ;;  %68 = vst [vmem:[#allocation0 + $0x18] sm:$0x3] %v142_v4  ;;  %v144_v6 = vld [vmem:[%s225_s0 + $0x2] sm:$0x3] }
   0x5   :  { %73 = vst [vmem:[#allocation0 + $0x10] sm:$0x3] %v143_v5  ;;  %v78_v7 = vld [vmem:[%s225_s0] sm:$0x3]  ;;  %77 = vst [vmem:[#allocation0 + $0x8] sm:$0x3] %v144_v6 }
   0x6   :  { %79 = vst [vmem:[#allocation0] sm:$0x3] %v78_v7  ;;  %v130_v8 = vld [vmem:[%s225_s0 + $0x1e] sm:$0x3]  ;;  %v131_v9 = vld [vmem:[%s225_s0 + $0x1c] sm:$0x3] }
   0x7   :  { %v132_v10 = vld [vmem:[%s225_s0 + $0x1a] sm:$0x3]  ;;  %8 = vst [vmem:[#allocation0 + $0x78] sm:$0x3] %v130_v8  ;;  %13 = vst [vmem:[#allocation0 + $0x70] sm:$0x3] %v131_v9 }
   0x8   :  { %18 = vst [vmem:[#allocation0 + $0x68] sm:$0x3] %v132_v10  ;;  %v133_v11 = vld [vmem:[%s225_s0 + $0x18] sm:$0x3]  ;;  %v134_v12 = vld [vmem:[%s225_s0 + $0x16] sm:$0x3] }
   0x9   :  { %v135_v13 = vld [vmem:[%s225_s0 + $0x14] sm:$0x3]  ;;  %23 = vst [vmem:[#allocation0 + $0x60] sm:$0x3] %v133_v11  ;;  %28 = vst [vmem:[#allocation0 + $0x58] sm:$0x3] %v134_v12 }
   0xa   :  { %33 = vst [vmem:[#allocation0 + $0x50] sm:$0x3] %v135_v13  ;;  %v136_v14 = vld [vmem:[%s225_s0 + $0x12] sm:$0x3]  ;;  %v137_v15 = vld [vmem:[%s225_s0 + $0x10] sm:$0x3] }
   0xb   :  { %38 = vst [vmem:[#allocation0 + $0x48] sm:$0x3] %v136_v14  ;;  %43 = vst [vmem:[#allocation0 + $0x40] sm:$0x3] %v137_v15  ;;  %s148_s0 = smov 8  }
   0xc   :  { %v98_v16 = vld [vmem:[#allocation0 + $0x1] ss:$8 sm:$0xf0]   ;;  %v81_v17 = vld [vmem:[#allocation0] ss:$8 sm:$0xf0]  }
   0xd   :  { %v96_v18 = vld [vmem:[#allocation0 + $0x1] ss:$8 sm:$0xf]   ;;  %v80_v19 = vld [vmem:[#allocation0] ss:$8 sm:$0xf]  }
   0xe   :  { %v100_v20 = vsel %vm82_vm0, %v98_v16, %v96_v18  ;;  %v83_v21 = vsel %vm82_vm0, %v81_v17, %v80_v19 }
   0xf   :  { %101 = vrot.lane.b32.xlu0 %v100_v20, %s148_s0  ;;  %85 = vst.msk [vmem:[%s226_s1] sm:$0xff] %vm84_vm1, %v83_v21  }
  0x10   :  { %v108_v22 = vld [vmem:[#allocation0 + $0x41] ss:$8 sm:$0xf0]   ;;  %v89_v23 = vld [vmem:[#allocation0 + $0x40] ss:$8 sm:$0xf0]  }
  0x12   :  { %v106_v24 = vld [vmem:[#allocation0 + $0x41] ss:$8 sm:$0xf]   ;;  %v87_v25 = vld [vmem:[#allocation0 + $0x40] ss:$8 sm:$0xf]  }
  0x13   :  { %v110_v26 = vsel %vm82_vm0, %v108_v22, %v106_v24  ;;  %v91_v27 = vsel %vm82_vm0, %v89_v23, %v87_v25 }
  0x14   :  { %145 = vst.msk [vmem:[%s226_s1 + $0x8] sm:$0xff] %vm84_vm1, %v91_v27   ;;  %111 = vrot.lane.b32.xlu0 %v110_v26, %s148_s0 }
  0x81   :  { %v102_v28 = vpop.permute.xlu0 %101  }
  0x82   :  { %104 = vst.msk [vmem:[%s226_s1] sm:$0xff] %vm103_vm2, %v102_v28  }
  0x86   :  { %v112_v29 = vpop.permute.xlu0 %111  }
  0x87   :  { %146 = vst.msk [vmem:[%s226_s1 + $0x8] sm:$0xff] %vm103_vm2, %v112_v29  }

// kernel: second_half_forward.1
= control target key start
LH: loop header
LB: loop body
LE: loop exit
PB: predicated region body
PF: predicated region fallthrough
CT: control target
= control target key end

     0   :  { %s2455_s0 = inlined_call_operand.vmem [shape: f32[16,32], index: 0, kind: input, shape index: {}]   ;;  %s2456_s1 = inlined_call_operand.vmem [shape: f32[16,32], index: 1, kind: input, shape index: {}]   ;;  %s2457_s2 = inlined_call_operand.vmem [shape: f32[16,32], index: 2, kind: input, shape index: {}]   ;;  %s2458_s3 = inlined_call_operand.vmem [shape: f32[16,16], index: 3, kind: input, shape index: {}]   ;;  %s2459_s4 = inlined_call_operand.vmem [shape: f32[16,16], index: 4, kind: input, shape index: {}]   ;;  %s2460_s5 = inlined_call_operand.vmem [shape: f32[16,16], index: 5, kind: input, shape index: {}]   ;;  %s2461_s6 = inlined_call_operand.vmem [shape: f32[2,1,32], index: 6, kind: input, shape index: {}]   ;;  %s2462_s7 = inlined_call_operand.vmem [shape: bf16[2,32,112], index: 7, kind: input, shape index: {}]   ;;  %s2463_s8 = inlined_call_operand.vmem [shape: bf16[2,32,32], index: 8, kind: input, shape index: {}]   ;;  %s2464_s9 = inlined_call_operand.vmem [shape: f32[2,1,32], index: 9, kind: input, shape index: {}]   ;;  %s2465_s10 = inlined_call_operand.vmem [shape: bf16[2,32,128], index: 10, kind: input, shape index: {}]   ;;  %s2466_s11 = inlined_call_operand.vmem [shape: bf16[2,64,32], index: 11, kind: input, shape index: {}]   ;;  %s2467_s12 = inlined_call_operand.vmem [shape: f32[1,32], index: 12, kind: input, shape index: {}]   ;;  %s2468_s13 = inlined_call_operand.vmem [shape: bf16[32,128], index: 13, kind: input, shape index: {}]   ;;  %s2469_s14 = inlined_call_operand.hbm [shape: f32[16,128], index: 14, kind: output, shape index: {}]  }
   0x1   :  { %2473 = sst [smem:[#allocation9_spill]] %s2467_s12 }
   0x2   :  { %2474 = sst [smem:[#allocation10_spill]] %s2469_s14 }
   0x3   :  { %19 = vsyncpa [#allocation4], 0  ;;  %s2173_s29 = smov 0   ;;  %s2175_s30 = smov 0  }
   0x4   :  { %s2177_s15 = smov 0  }
   0x5 LB: > { %2475 = sst [smem:[#allocation6_spill]] %s2075_s30  ;;  %s34_s17 = sadd.s32 1, %s2075_s30  ;;  %s2079_s15 = sphi %s2177_s15, %s25_s15   ;;  %s2075_s30 = sphi %s2175_s30, %s2486_s30   ;;  %s2071_s29 = sphi %s2173_s29, %s2485_s29  }
   0x6   : > { %2476 = sst [smem:[#allocation7_spill]] %s2079_s15  ;;  %p35_p0 = scmp.ge.s32.totalorder %s34_s17, 2 }
   0x7   : > { %p1729_p1 = scmp.ge.s32.totalorder %s2079_s15, 1  ;;  %p482_p2 = scmp.lt.s32.totalorder %s2079_s15, 3 }
   0x8   : > { %s2488_s17 = smov (%p35_p0, %s34_s17), 0 }
   0x9   : > { %2477 = sst [smem:[#allocation8_spill]] %s2488_s17  ;;  %p483_p3 = pnand %p1729_p1, %p482_p2 }
   0xa   : > { %p555_p4 = scmp.lt.s32.totalorder (!%p483_p3), %s2071_s29, 1  ;;  %p1738_p5 = scmp.ne.s32.totalorder (!%p483_p3), %s2071_s29, 0 }
   0xb   : > { %486 = sbr.rel (%p483_p3) target bundleno = 2914 (0xb62), region = 76 }
  0x12   : > { %s2196_s18 = scalar_select %p555_p4, %s2071_s29, 1 }
  0x13   : > { %586 = sbr.rel (%p1738_p5) target bundleno = 26 (0x1a), region = 80  ;;  %v587_v0 = vld [vmem:[%s2455_s0] sm:$0xff] (!%p1738_p5)  ;;  %vm589_vm0 = vcmask (!%p1738_p5), 261120   ;;  %v588_v1 = vld [vmem:[%s2455_s0 + $0x8] sm:$0xff] (!%p1738_p5) }
  0x14   : > { %s1772_s22 = sshll.u32 %s2196_s18, 4  ;;  %s570_s30 = scalar_lea.vmem %s2464_s9, %s2196_s18  ;;  %590 = vst.msk [vmem:[#allocation2] sm:$0xff] (!%p1738_p5), %vm589_vm0, %v587_v0  ;;  %591 = vst.msk [vmem:[#allocation2 + $0x8] sm:$0xff] (!%p1738_p5), %vm589_vm0, %v588_v1 }
  0x15   : > { %s562_s25 = scalar_lea.vmem %s2462_s7, %s1772_s22  ;;  %s2209_s28 = scalar_lea.vmem %s2463_s8, %s1772_s22 }
  0x16   : > { %s2218_s20 = scalar_lea.vmem %s2465_s10, %s1772_s22  ;;  %s1775_s21 = sshll.u32 %s2196_s18, 5 }
  0x17   : > { %s2224_s23 = scalar_lea.vmem %s2466_s11, %s1775_s21 }
  0x1a PF: > { %vm597_vm1 = vcmask 261120   ;;  %v1963_v8 = vld [vmem:[%s562_s25] sm:$0xff]   ;;  %v2081_v9 = vmov 0.0   ;;  %vm2082_vm2 = vmmov 0   ;;  %v1964_v10 = vld [vmem:[%s562_s25 + $0x8] sm:$0xff]   ;;  %s2083_s15 = smov 80   ;;  %s2478_s25 = scalar_lea.vmem %s2461_s6, %s2196_s18 }
  0x1b   : > { %v2233_v2 = vld [vmem:[#allocation2] sm:$0xff]  ;;  %v2235_v3 = vld [vmem:[#allocation2 + $0x8] sm:$0xff]  ;;  %1809 = vmatprep.subr.bf16.mxu0 %v2081_v9  ;;  %1813 = vmatprep.mubr.msk.bf16.mxu0 %vm2082_vm2, %v2081_v9  ;;  %s2084_s19 = smov 32   ;;  %s2085_s12 = smov 64   ;;  %vm749_vm3 = vcmask 64512   ;;  %vm797_vm4 = vcmask 130048  }
  0x1c   : > { %v595_v4 = vmul.f32 %v2233_v2, %v2233_v2  ;;  %v596_v5 = vmul.f32 %v2235_v3, %v2235_v3  ;;  %1810 = vmatpush3.bf16.msra.mxu0 %v1963_v8  ;;  %1817 = vmatprep.subr.bf16.mxu1 %v2081_v9  ;;  %v720_v11 = vld [vmem:[%s2459_s4] sm:$0xff]  ;;  %v721_v13 = vld [vmem:[%s2459_s4 + $0x8] sm:$0xff]  ;;  %s2086_s27 = smov 112   ;;  %s2087_s24 = smov 96   ;;  %vm1246_vm5 = vcmask 195584   ;;  %vm1453_vm6 = vcmask 523264  }
  0x1d   : > { %1811 = vmatprep.subr.bf16.mxu0 %v2081_v9  ;;  %1819 = vmatprep.mubr.msk.bf16.mxu1 %vm2082_vm2, %v2081_v9  ;;  %v686_v12 = vld [vmem:[%s2457_s2] sm:$0xff]  ;;  %v687_v14 = vld [vmem:[%s2457_s2 + $0x8] sm:$0xff]  ;;  %s2088_s21 = smov 56   ;;  %s2090_s22 = smov 104  }
  0x1e   : > { %v598_v6 = vsel %vm597_vm1, %v595_v4, 0.0  ;;  %v601_v7 = vsel %vm597_vm1, %v596_v5, 0.0  ;;  %724 = vrot.lane.b32.xlu1 %v720_v11, %s2083_s15  ;;  %v708_v15 = vld [vmem:[%s2458_s3] sm:$0xff]  ;;  %v709_v16 = vld [vmem:[%s2458_s3 + $0x8] sm:$0xff]  ;;  %s2091_s16 = smov 24   ;;  %s2093_s17 = smov 16  }
  0x1f   : > { %599 = vadd.xlane.f32.xlu0 %v598_v6  ;;  %v1739_v26 = vld [vmem:[%s2478_s25] ss:$0 sm:$0xff]  ;;  %v683_v49 = vld [vmem:[%s2456_s1 + $0x8] sm:$0xff]  ;;  %p1763_p6 = scmp.ne.s32.totalorder %s2071_s29, 1 }
  0x20   : > { %1812 = vmatpush3.bf16.msra.mxu0 %v1964_v10  ;;  %v682_v51 = vld [vmem:[%s2456_s1] sm:$0xff]  ;;  %v743_v10 = vld [vmem:[%s2460_s5 + $0x8] sm:$0xff]  ;;  %vm2095_vm7 = vmmov (!%p1763_p6), 0  }
  0x21   : > { %1823 = vmatprep.subr.bf16.mxu0 %v2081_v9 }
  0x22   : > { %726 = vrot.lane.b32.xlu1 %v721_v13, %s2083_s15  ;;  %s2089_s15 = smov 120  }
  0x23   : > { %602 = vadd.xlane.f32.xlu0 %v601_v7  ;;  %v742_v7 = vld [vmem:[%s2460_s5] sm:$0xff] }
  0x26   : > { %692 = vrot.lane.b32.xlu1 %v687_v14, %s2084_s19 }
  0x2a   : > { %712 = vrot.lane.b32.xlu1 %v708_v15, %s2085_s12 }
  0x2e   : > { %714 = vrot.lane.b32.xlu1 %v709_v16, %s2085_s12 }
  0x39   : > { %690 = vrot.lane.b32.xlu0 %v686_v12, %s2084_s19 }
  0x90   : > { %v725_v31 = vpop.permute.xlu1 %724 }
  0x94   : > { %v727_v32 = vpop.permute.xlu1 %726 }
  0x98   : > { %v693_v36 = vpop.permute.xlu1 %692 }
  0x9c   : > { %v713_v44 = vpop.permute.xlu1 %712 }
  0xa0   : > { %v715_v45 = vpop.permute.xlu1 %714 }
  0xac   : > { %v600_v17 = vpop.xlane.xlu0 %599 }
  0xad   : > { %v605_v18 = vmul.f32 0.03125, %v600_v17 }
  0xaf   : > { %v607_v19 = vadd.f32 1e-05, %v605_v18 }
  0xb0   : > { %v603_v20 = vpop.xlane.xlu0 %602 }
  0xb1   : > { %1973 = vrsqrt.f32 %v607_v19  ;;  %v606_v21 = vmul.f32 0.03125, %v603_v20 }
  0xb3   : > { %v608_v22 = vadd.f32 1e-05, %v606_v21 }
  0xb4   : > { %v691_v42 = vpop.permute.xlu0 %690 }
  0xb5   : > { %1975 = vrsqrt.f32 %v608_v22 }
  0xbb   : > { %v1974_v23 = vpop.eup %1973 }
  0xbc   : > { %v611_v24 = vmul.f32 %v1974_v23, %v2233_v2 }
  0xbe   : > { %v619_v28 = vmul.f32 %v1739_v26, %v611_v24 }
  0xbf   : > { %v1976_v25 = vpop.eup %1975 }
  0xc0   : > { %v612_v27 = vmul.f32 %v1976_v25, %v2235_v3 }
  0xc2   : > { %v620_v29 = vmul.f32 %v1739_v26, %v612_v27 }
  0xc4   : > { %v625_v30 = vpack.c.bf16 %v620_v29, %v619_v28 }
  0xc6   : > { %1814 = vmatmul.mubr.msk.bf16.vlgmr.msra.gmra.mrb[0].mxu0 %vm597_vm1, %v625_v30 }
  0xc7   : > { %1825 = vmatprep.mubr.msk.bf16.mxu0 %vm2082_vm2, %v2081_v9 }
 0x199   : > { %v675_v33 = vpop.f32.mrb[0].mxu0 }
 0x19a   : > { %v1815_v34 = vpop.f32.mrb[1].mxu0  ;;  %v730_v35 = vmul.f32 %v725_v31, %v675_v33  ;;  %v696_v43 = vmul.f32 %v691_v42, %v675_v33  ;;  %v718_v47 = vmul.f32 %v713_v44, %v675_v33  ;;  %v684_v57 = vmul.f32 %v682_v51, %v675_v33 }
 0x19b   : > { %v678_v37 = vpop.f32.mrb[2].mxu0 }
 0x19c   : > { %734 = vrot.lane.b32.xlu1 %v730_v35, %s2086_s27  ;;  %v1816_v38 = vpop.f32.mrb[3].mxu0  ;;  %v697_v39 = vmul.f32 %v693_v36, %v678_v37  ;;  %v2284_v40 = vpack.c.bf16 %v678_v37, %v675_v33  ;;  %v731_v41 = vmul.f32 %v727_v32, %v678_v37  ;;  %v719_v48 = vmul.f32 %v715_v45, %v678_v37 }
 0x19d   : > { %v685_v55 = vmul.f32 %v683_v49, %v678_v37 }
 0x19e   : > { %702 = vrot.lane.b32.xlu0 %v697_v39, %s2087_s24 }
 0x1a0   : > { %736 = vrot.lane.b32.xlu1 %v731_v41, %s2086_s27 }
 0x1a4   : > { %700 = vrot.lane.b32.xlu1 %v696_v43, %s2087_s24 }
 0x20e   : > { %v735_v46 = vpop.permute.xlu1 %734 }
 0x20f   : > { %v740_v52 = vadd.f32 %v735_v46, %v718_v47 }
 0x210   : > { %v703_v54 = vpop.permute.xlu0 %702 }
 0x211   : > { %v707_v59 = vadd.f32 %v703_v54, %v685_v55 }
 0x212   : > { %v737_v50 = vpop.permute.xlu1 %736 }
 0x213   : > { %v741_v53 = vadd.f32 %v737_v50, %v719_v48 }
 0x215   : > { %v745_v56 = vpack.c.bf16 %v741_v53, %v740_v52 }
 0x216   : > { %v701_v58 = vpop.permute.xlu1 %700 }
 0x217   : > { %v706_v60 = vadd.f32 %v701_v58, %v684_v57  ;;  %747 = vrot.lane.b32.xlu1 %v745_v56, %s2085_s12 }
 0x219   : > { %v744_v61 = vpack.c.bf16 %v707_v59, %v706_v60 }
 0x21b   : > { %986 = vrot.lane.b32.xlu1 %v745_v56, %s2088_s21  ;;  %871 = vrot.lane.b32.xlu0 %v744_v61, %s2089_s15  ;;  %s2479_s21 = sld [smem:[#allocation9_spill]] (!%p1763_p6) }
 0x21f   : > { %1105 = vrot.lane.b32.xlu1 %v744_v61, %s2090_s22  ;;  %984 = vrot.lane.b32.xlu0 %v744_v61, %s2086_s27 }
 0x289   : > { %v748_v62 = vpop.permute.xlu1 %747 }
 0x28a   : > { %v754_v63 = vsel %vm749_vm3, %v748_v62, 0 }
 0x28b   : > { %1818 = vmatpush3.bf16.xpose.msra.mxu1 %v754_v63 }
 0x28c   : > { %1829 = vmatprep.subr.bf16.mxu1 %v2081_v9 }
 0x28d   : > { %v987_v0 = vpop.permute.xlu1 %986  ;;  %v872_v1 = vpop.permute.xlu0 %871 }
 0x28e   : > { %v992_v4 = vsel %vm749_vm3, %v987_v0, 0 }
 0x291   : > { %v985_v5 = vpop.permute.xlu0 %984  ;;  %v1106_v6 = vpop.permute.xlu1 %1105 }
 0x292   : > { %1820 = vmatmul.mubr.msk.bf16.vlgmr.msra.gmra.mrb[0].mxu1 %vm749_vm3, %v744_v61 }
 0x293   : > { %1830 = vmatpush3.bf16.xpose.msra.mxu1 %v754_v63  ;;  %1831 = vmatprep.mubr.msk.bf16.mxu1 %vm2082_vm2, %v2081_v9 }
 0x294   : > { %1841 = vmatprep.subr.bf16.mxu1 %v2081_v9 }
 0x29a   : > { %1832 = vmatmul.mubr.msk.bf16.vlgmr.msra.gmra.mrb[4].mxu1 %vm749_vm3, %v872_v1 }
 0x29b   : > { %1842 = vmatpush3.bf16.xpose.msra.mxu1 %v992_v4  ;;  %1843 = vmatprep.mubr.msk.bf16.mxu1 %vm2082_vm2, %v2081_v9 }
 0x29c   : > { %1853 = vmatprep.subr.bf16.mxu1 %v2081_v9 }
 0x2a2   : > { %1844 = vmatmul.mubr.msk.bf16.vlgmr.msra.gmra.mrb[8].mxu1 %vm749_vm3, %v985_v5 }
 0x2a3   : > { %1854 = vmatpush3.bf16.xpose.msra.mxu1 %v992_v4  ;;  %1855 = vmatprep.mubr.msk.bf16.mxu1 %vm2082_vm2, %v2081_v9 }
 0x2a4   : > { %1865 = vmatprep.subr.bf16.mxu1 %v2081_v9 }
 0x2aa   : > { %1856 = vmatmul.mubr.msk.bf16.vlgmr.msra.gmra.mrb[12].mxu1 %vm749_vm3, %v1106_v6 }
 0x2ab   : > { %1869 = vmatprep.mubr.msk.bf16.mxu1 %vm2082_vm2, %v2081_v9 }
 0x365   : > { %v790_v8 = vpop.f32.mrb[0].mxu1 }
 0x366   : > { %v791_v11 = vadd.f32 %v790_v8, %v742_v7  ;;  %v1821_v12 = vpop.f32.mrb[1].mxu1 }
 0x367   : > { %v793_v13 = vpop.f32.mrb[2].mxu1 }
 0x368   : > { %v794_v14 = vadd.f32 %v793_v13, %v743_v10  ;;  %v1822_v15 = vpop.f32.mrb[3].mxu1  ;;  %v798_v16 = vsel %vm797_vm4, %v791_v11, -inf }
 0x369   : > { %799 = vmax.xlane.f32.xlu0 %v798_v16 }
 0x36a   : > { %v801_v17 = vsel %vm797_vm4, %v794_v14, -inf }
 0x36b   : > { %802 = vmax.xlane.f32.xlu1 %v801_v17 }
 0x36d   : > { %v910_v18 = vpop.f32.mrb[4].mxu1 }
 0x36e   : > { %v911_v19 = vadd.f32 %v910_v18, %v742_v7  ;;  %v1833_v20 = vpop.f32.mrb[5].mxu1 }
 0x36f   : > { %v913_v21 = vpop.f32.mrb[6].mxu1 }
 0x370   : > { %v914_v22 = vadd.f32 %v913_v21, %v743_v10  ;;  %v1834_v23 = vpop.f32.mrb[7].mxu1  ;;  %v917_v24 = vsel %vm797_vm4, %v911_v19, -inf }
 0x371   : > { %918 = vmax.xlane.f32.xlu0 %v917_v24 }
 0x372   : > { %v920_v25 = vsel %vm797_vm4, %v914_v22, -inf }
 0x375   : > { %921 = vmax.xlane.f32.xlu0 %v920_v25  ;;  %v1028_v26 = vpop.f32.mrb[8].mxu1 }
 0x376   : > { %v1029_v27 = vadd.f32 %v1028_v26, %v742_v7  ;;  %v1845_v28 = vpop.f32.mrb[9].mxu1 }
 0x377   : > { %v1031_v29 = vpop.f32.mrb[10].mxu1 }
 0x378   : > { %v1032_v30 = vadd.f32 %v1031_v29, %v743_v10  ;;  %v1846_v31 = vpop.f32.mrb[11].mxu1  ;;  %v1035_v32 = vsel %vm797_vm4, %v1029_v27, -inf }
 0x379   : > { %1036 = vmax.xlane.f32.xlu1 %v1035_v32 }
 0x37a   : > { %v1038_v33 = vsel %vm797_vm4, %v1032_v30, -inf }
 0x37b   : > { %1039 = vmax.xlane.f32.xlu0 %v1038_v33 }
 0x37d   : > { %v1144_v34 = vpop.f32.mrb[12].mxu1 }
 0x37e   : > { %v1145_v35 = vadd.f32 %v1144_v34, %v742_v7  ;;  %v1857_v36 = vpop.f32.mrb[13].mxu1 }
 0x37f   : > { %v1147_v37 = vpop.f32.mrb[14].mxu1 }
 0x380   : > { %v1148_v38 = vadd.f32 %v1147_v37, %v743_v10  ;;  %v1858_v39 = vpop.f32.mrb[15].mxu1  ;;  %v1151_v41 = vsel %vm797_vm4, %v1145_v35, -inf }
 0x381   : > { %1152 = vmax.xlane.f32.xlu1 %v1151_v41 }
 0x382   : > { %v1154_v42 = vsel %vm797_vm4, %v1148_v38, -inf }
 0x383   : > { %1155 = vmax.xlane.f32.xlu0 %v1154_v42 }
 0x3f6   : > { %v800_v43 = vpop.xlane.xlu0 %799 }
 0x3f7   : > { %v804_v44 = vsub.f32 %v791_v11, %v800_v43 }
 0x3f8   : > { %v803_v45 = vpop.xlane.xlu1 %802 }
 0x3f9   : > { %v806_v46 = vmul.f32 1.442695, %v804_v44  ;;  %v805_v47 = vsub.f32 %v794_v14, %v803_v45 }
 0x3fb   : > { %1977 = vpow2.f32 %v806_v46  ;;  %v808_v48 = vmul.f32 1.442695, %v805_v47 }
 0x3fd   : > { %1979 = vpow2.f32 %v808_v48 }
 0x3fe   : > { %v919_v49 = vpop.xlane.xlu0 %918 }
 0x3ff   : > { %v923_v50 = vsub.f32 %v911_v19, %v919_v49 }
 0x401   : > { %v925_v51 = vmul.f32 1.442695, %v923_v50 }
 0x402   : > { %v922_v52 = vpop.xlane.xlu0 %921 }
 0x403   : > { %1981 = vpow2.f32 %v925_v51  ;;  %v924_v53 = vsub.f32 %v914_v22, %v922_v52 }
 0x405   : > { %v1978_v54 = vpop.eup %1977  ;;  %v927_v55 = vmul.f32 1.442695, %v924_v53 }
 0x406   : > { %v1037_v56 = vpop.xlane.xlu1 %1036  ;;  %v810_v57 = vsel %vm797_vm4, %v1978_v54, 0.0 }
 0x407   : > { %v1980_v58 = vpop.eup %1979  ;;  %1983 = vpow2.f32 %v927_v55  ;;  %v1041_v59 = vsub.f32 %v1029_v27, %v1037_v56  ;;  %811 = vadd.xlane.f32.xlu1 %v810_v57 }
 0x408   : > { %v1040_v60 = vpop.xlane.xlu0 %1039  ;;  %v813_v61 = vsel %vm797_vm4, %v1980_v58, 0.0 }
 0x409   : > { %v1043_v62 = vmul.f32 1.442695, %v1041_v59  ;;  %v1042_v63 = vsub.f32 %v1032_v30, %v1040_v60  ;;  %814 = vadd.xlane.f32.xlu0 %v813_v61  ;;  %v1965_v59 = vld [vmem:[%s2209_s28] sm:$0xff]  }
 0x40a   : > { %1866 = vmatpush3.bf16.msra.mxu1 %v1965_v59 }
 0x40b   : > { %1985 = vpow2.f32 %v1043_v62  ;;  %v1045_v0 = vmul.f32 1.442695, %v1042_v63  ;;  %1867 = vmatprep.subr.bf16.mxu1 %v2081_v9 }
 0x40d   : > { %v1982_v1 = vpop.eup %1981  ;;  %1987 = vpow2.f32 %v1045_v0  ;;  %v1966_v0 = vld [vmem:[%s2209_s28 + $0x8] sm:$0xff]  }
 0x40e   : > { %v1153_v4 = vpop.xlane.xlu1 %1152  ;;  %v929_v5 = vsel %vm797_vm4, %v1982_v1, 0.0  ;;  %1868 = vmatpush3.bf16.msra.mxu1 %v1966_v0 }
 0x40f   : > { %v1157_v6 = vsub.f32 %v1145_v35, %v1153_v4  ;;  %930 = vadd.xlane.f32.xlu1 %v929_v5  ;;  %1881 = vmatprep.subr.bf16.mxu1 %v2081_v9 }
 0x410   : > { %v1156_v7 = vpop.xlane.xlu0 %1155 }
 0x411   : > { %v1984_v8 = vpop.eup %1983  ;;  %v1159_v10 = vmul.f32 1.442695, %v1157_v6  ;;  %v1158_v11 = vsub.f32 %v1148_v38, %v1156_v7 }
 0x412   : > { %v932_v12 = vsel %vm797_vm4, %v1984_v8, 0.0 }
 0x413   : > { %1989 = vpow2.f32 %v1159_v10  ;;  %v1161_v13 = vmul.f32 1.442695, %v1158_v11  ;;  %933 = vadd.xlane.f32.xlu0 %v932_v12 }
 0x415   : > { %v1986_v14 = vpop.eup %1985  ;;  %1991 = vpow2.f32 %v1161_v13 }
 0x416   : > { %v1047_v15 = vsel %vm797_vm4, %v1986_v14, 0.0 }
 0x417   : > { %v1988_v16 = vpop.eup %1987  ;;  %1048 = vadd.xlane.f32.xlu1 %v1047_v15 }
 0x418   : > { %v1050_v17 = vsel %vm797_vm4, %v1988_v16, 0.0 }
 0x419   : > { %1051 = vadd.xlane.f32.xlu0 %v1050_v17 }
 0x41d   : > { %v1990_v18 = vpop.eup %1989 }
 0x41e   : > { %v1163_v19 = vsel %vm797_vm4, %v1990_v18, 0.0 }
 0x41f   : > { %v1992_v20 = vpop.eup %1991  ;;  %1164 = vadd.xlane.f32.xlu1 %v1163_v19 }
 0x420   : > { %v1166_v21 = vsel %vm797_vm4, %v1992_v20, 0.0 }
 0x421   : > { %1167 = vadd.xlane.f32.xlu0 %v1166_v21 }
 0x430   : > { %823 = vrot.lane.b32.xlu1 %v2284_v40, %s2084_s19  ;;  %s2092_s19 = smov 8  }
 0x437   : > { %1058 = vrot.lane.b32.xlu0 %v2284_v40, %s2091_s16 }
 0x494   : > { %v812_v23 = vpop.xlane.xlu1 %811 }
 0x496   : > { %v815_v22 = vpop.xlane.xlu0 %814 }
 0x497   : > { %1993 = vrcp.f32 %v815_v22 }
 0x498   : > { %1995 = vrcp.f32 %v812_v23 }
 0x49c   : > { %v931_v24 = vpop.xlane.xlu1 %930 }
 0x4a0   : > { %v934_v25 = vpop.xlane.xlu0 %933 }
 0x4a1   : > { %1997 = vrcp.f32 %v934_v25  ;;  %v1994_v27 = vpop.eup %1993 }
 0x4a2   : > { %1999 = vrcp.f32 %v931_v24  ;;  %v1996_v29 = vpop.eup %1995  ;;  %v819_v30 = vmul.f32 %v1994_v27, %v1980_v58 }
 0x4a3   : > { %v818_v32 = vmul.f32 %v1996_v29, %v1978_v54 }
 0x4a4   : > { %v1049_v26 = vpop.xlane.xlu1 %1048 }
 0x4a5   : > { %v820_v34 = vpack.c.bf16 %v819_v30, %v818_v32 }
 0x4a6   : > { %v1052_v31 = vpop.xlane.xlu0 %1051 }
 0x4a7   : > { %2001 = vrcp.f32 %v1052_v31 }
 0x4a8   : > { %2003 = vrcp.f32 %v1049_v26 }
 0x4ab   : > { %v1998_v40 = vpop.eup %1997 }
 0x4ac   : > { %v1165_v28 = vpop.xlane.xlu1 %1164  ;;  %v2000_v35 = vpop.eup %1999  ;;  %v938_v36 = vmul.f32 %v1998_v40, %v1984_v8 }
 0x4ad   : > { %v937_v38 = vmul.f32 %v2000_v35, %v1982_v1 }
 0x4ae   : > { %v1168_v37 = vpop.xlane.xlu0 %1167 }
 0x4af   : > { %2005 = vrcp.f32 %v1168_v37  ;;  %v939_v39 = vpack.c.bf16 %v938_v36, %v937_v38  ;;  %v1968_v37 = vld [vmem:[%s2218_s20 + $0x8] sm:$0xff]  }
 0x4b0   : > { %v824_v33 = vpop.permute.xlu1 %823  ;;  %2007 = vrcp.f32 %v1165_v28 }
 0x4b1   : > { %1824 = vmatpush3.bf16.msra.mxu0 %v824_v33  ;;  %v2002_v41 = vpop.eup %2001 }
 0x4b2   : > { %1835 = vmatprep.subr.bf16.mxu0 %v2081_v9  ;;  %v1059_v42 = vpop.permute.xlu0 %1058  ;;  %v2004_v43 = vpop.eup %2003  ;;  %v1056_v44 = vmul.f32 %v2002_v41, %v1988_v16 }
 0x4b3   : > { %v1055_v45 = vmul.f32 %v2004_v43, %v1986_v14 }
 0x4b4   : > { %1826 = vmatmul.mubr.msk.bf16.vlgmr.msra.gmra.mrb[4].mxu0 %vm797_vm4, %v820_v34 }
 0x4b5   : > { %1836 = vmatpush3.bf16.msra.mxu0 %v824_v33  ;;  %1837 = vmatprep.mubr.msk.bf16.mxu0 %vm2082_vm2, %v2081_v9  ;;  %v1057_v46 = vpack.c.bf16 %v1056_v44, %v1055_v45 }
 0x4b6   : > { %1847 = vmatprep.subr.bf16.mxu0 %v2081_v9 }
 0x4b9   : > { %v2006_v47 = vpop.eup %2005 }
 0x4ba   : > { %v2008_v48 = vpop.eup %2007  ;;  %v1172_v49 = vmul.f32 %v2006_v47, %v1992_v20  ;;  %v1754_v47 = vld [vmem:[%s570_s30] ss:$0 sm:$0xff] }
 0x4bb   : > { %v1171_v50 = vmul.f32 %v2008_v48, %v1990_v18 }
 0x4bc   : > { %1838 = vmatmul.mubr.msk.bf16.vlgmr.msra.gmra.mrb[8].mxu0 %vm797_vm4, %v939_v39 }
 0x4bd   : > { %1848 = vmatpush3.bf16.msra.mxu0 %v1059_v42  ;;  %1849 = vmatprep.mubr.msk.bf16.mxu0 %vm2082_vm2, %v2081_v9  ;;  %v1173_v51 = vpack.c.bf16 %v1172_v49, %v1171_v50 }
 0x4be   : > { %1859 = vmatprep.subr.bf16.mxu0 %v2081_v9 }
 0x4c4   : > { %1850 = vmatmul.mubr.msk.bf16.vlgmr.msra.gmra.mrb[12].mxu0 %vm797_vm4, %v1057_v46 }
 0x4c5   : > { %1860 = vmatpush3.bf16.msra.mxu0 %v1059_v42  ;;  %1861 = vmatprep.mubr.msk.bf16.mxu0 %vm2082_vm2, %v2081_v9 }
 0x4c6   : > { %1873 = vmatprep.subr.bf16.mxu0 %v2081_v9 }
 0x4cc   : > { %1862 = vmatmul.mubr.msk.bf16.vlgmr.msra.gmra.mrb[16].mxu0 %vm797_vm4, %v1173_v51 }
 0x4cd   : > { %1877 = vmatprep.mubr.msk.bf16.mxu0 %vm2082_vm2, %v2081_v9 }
 0x587   : > { %v863_v52 = vpop.f32.mrb[4].mxu0 }
 0x588   : > { %v1827_v53 = vpop.f32.mrb[5].mxu0 }
 0x589   : > { %v866_v54 = vpop.f32.mrb[6].mxu0  ;;  %v1970_v53 = vld [vmem:[%s2224_s23 + $0x8] sm:$0xff]  }
 0x58a   : > { %v1828_v55 = vpop.f32.mrb[7].mxu0 }
 0x58b   : > { %v1972_v55 = vld [vmem:[%s2224_s23 + $0x18] sm:$0xff]  }
 0x58f   : > { %v977_v56 = vpop.f32.mrb[8].mxu0 }
 0x590   : > { %v1839_v57 = vpop.f32.mrb[9].mxu0 }
 0x591   : > { %v980_v58 = vpop.f32.mrb[10].mxu0 }
 0x592   : > { %v1948_v60 = vpack.i.bf16 %v980_v58, %v977_v56  ;;  %v1840_v61 = vpop.f32.mrb[11].mxu0 }
 0x594   : > { %1949 = vrot.lane.b32.xlu1 %v1948_v60, %s2092_s19 }
 0x597   : > { %v1098_v62 = vpop.f32.mrb[12].mxu0 }
 0x598   : > { %v1851_v63 = vpop.f32.mrb[13].mxu0 }
 0x599   : > { %v1101_v1 = vpop.f32.mrb[14].mxu0 }
 0x59a   : > { %v1953_v4 = vpack.i.bf16 %v1101_v1, %v1098_v62  ;;  %v1852_v5 = vpop.f32.mrb[15].mxu0 }
 0x59c   : > { %1954 = vrot.lane.b32.xlu1 %v1953_v4, %s2093_s17 }
 0x59f   : > { %v1211_v6 = vpop.f32.mrb[16].mxu0 }
 0x5a0   : > { %v1863_v7 = vpop.f32.mrb[17].mxu0 }
 0x5a1   : > { %v1214_v8 = vpop.f32.mrb[18].mxu0 }
 0x5a2   : > { %v1958_v10 = vpack.i.bf16 %v1214_v8, %v1211_v6  ;;  %v1864_v11 = vpop.f32.mrb[19].mxu0 }
 0x5a4   : > { %1959 = vrot.lane.b32.xlu0 %v1958_v10, %s2091_s16 }
 0x606   : > { %v1950_v12 = vpop.permute.xlu1 %1949 }
 0x607   : > { %v1952_v14 = vunpack.i.h.bf16 %v1950_v12  ;;  %v1951_v15 = vunpack.i.l.bf16 %v1950_v12 }
 0x609   : > { %v1243_v19 = vsel %vm749_vm3, %v866_v54, %v1952_v14  ;;  %v1242_v20 = vsel %vm749_vm3, %v863_v52, %v1951_v15  ;;  %v1969_v52 = vld [vmem:[%s2224_s23] sm:$0xff]   ;;  %v1971_v54 = vld [vmem:[%s2224_s23 + $0x10] sm:$0xff]  }
 0x60e   : > { %v1955_v13 = vpop.permute.xlu1 %1954 }
 0x60f   : > { %v1957_v16 = vunpack.i.h.bf16 %v1955_v13  ;;  %v1956_v17 = vunpack.i.l.bf16 %v1955_v13 }
 0x611   : > { %v1245_v23 = vsel %vm797_vm4, %v1243_v19, %v1957_v16  ;;  %v1244_v24 = vsel %vm797_vm4, %v1242_v20, %v1956_v17 }
 0x616   : > { %v1960_v18 = vpop.permute.xlu0 %1959 }
 0x617   : > { %v1962_v21 = vunpack.i.h.bf16 %v1960_v18  ;;  %v1961_v22 = vunpack.i.l.bf16 %v1960_v18 }
 0x619   : > { %v1248_v25 = vsel %vm1246_vm5, %v1245_v23, %v1962_v21  ;;  %v1247_v26 = vsel %vm1246_vm5, %v1244_v24, %v1961_v22 }
 0x61a   : > { %v1253_v27 = vpack.c.bf16 %v1248_v25, %v1247_v26  ;;  %v2021_v25 = vld [vmem:[%s2468_s13] sm:$0xff] (!%p1763_p6)   ;;  %v2094_v26 = vmov (!%p1763_p6), 0.0  }
 0x61c   : > { %1870 = vmatmul.mubr.msk.bf16.vlgmr.msra.gmra.mrb[16].mxu1 %vm597_vm1, %v1253_v27  ;;  %v2022_v27 = vld [vmem:[%s2468_s13 + $0x8] sm:$0xff] (!%p1763_p6)  }
 0x61d   : > { %1889 = vmatprep.mubr.msk.bf16.mxu1 %vm2082_vm2, %v2081_v9  ;;  %1882 = vmatpush3.bf16.msra.mxu1 %v1969_v52 }
 0x61e   : > { %1883 = vmatprep.subr.bf16.mxu1 %v2081_v9 }
 0x621   : > { %1884 = vmatpush3.bf16.msra.mxu1 %v1970_v53 }
 0x622   : > { %1885 = vmatprep.subr.bf16.mxu1 %v2081_v9 }
 0x625   : > { %1886 = vmatpush3.bf16.msra.mxu1 %v1971_v54 }
 0x626   : > { %1887 = vmatprep.subr.bf16.mxu1 %v2081_v9 }
 0x629   : > { %1888 = vmatpush3.bf16.msra.mxu1 %v1972_v55 }
 0x6ef   : > { %v1303_v28 = vpop.f32.mrb[16].mxu1 }
 0x6f0   : > { %v2369_v29 = vadd.f32 %v1303_v28, %v2233_v2  ;;  %v1871_v30 = vpop.f32.mrb[17].mxu1  ;;  %v1967_v2 = vld [vmem:[%s2218_s20] sm:$0xff]  }
 0x6f1   : > { %v1306_v31 = vpop.f32.mrb[18].mxu1  ;;  %1874 = vmatpush3.bf16.msra.mxu0 %v1967_v2 }
 0x6f2   : > { %v2372_v32 = vadd.f32 %v1306_v31, %v2235_v3  ;;  %v1872_v33 = vpop.f32.mrb[19].mxu1  ;;  %v1313_v34 = vmul.f32 %v2369_v29, %v2369_v29  ;;  %1875 = vmatprep.subr.bf16.mxu0 %v2081_v9 }
 0x6f4   : > { %v1315_v40 = vsel %vm597_vm1, %v1313_v34, 0.0  ;;  %v1314_v35 = vmul.f32 %v2372_v32, %v2372_v32 }
 0x6f5   : > { %1316 = vadd.xlane.f32.xlu1 %v1315_v40  ;;  %1876 = vmatpush3.bf16.msra.mxu0 %v1968_v37 }
 0x6f6   : > { %v1318_v36 = vsel %vm597_vm1, %v1314_v35, 0.0  ;;  %1893 = vmatprep.subr.bf16.mxu0 (!%p1763_p6), %v2094_v26 }
 0x6f7   : > { %1319 = vadd.xlane.f32.xlu0 %v1318_v36  ;;  %v1764_v36 = vld [vmem:[%s2479_s21] ss:$0 sm:$0xff] (!%p1763_p6) }
 0x782   : > { %v1317_v3 = vpop.xlane.xlu1 %1316 }
 0x783   : > { %v1321_v38 = vmul.f32 0.03125, %v1317_v3 }
 0x784   : > { %v1320_v39 = vpop.xlane.xlu0 %1319 }
 0x785   : > { %v1323_v41 = vadd.f32 1e-05, %v1321_v38  ;;  %v1322_v42 = vmul.f32 0.03125, %v1320_v39 }
 0x787   : > { %2009 = vrsqrt.f32 %v1323_v41  ;;  %v1324_v43 = vadd.f32 1e-05, %v1322_v42 }
 0x789   : > { %2011 = vrsqrt.f32 %v1324_v43 }
 0x791   : > { %v2010_v44 = vpop.eup %2009 }
 0x792   : > { %v1327_v45 = vmul.f32 %v2010_v44, %v2369_v29 }
 0x793   : > { %v2012_v46 = vpop.eup %2011 }
 0x794   : > { %v1328_v48 = vmul.f32 %v2012_v46, %v2372_v32  ;;  %v1335_v49 = vmul.f32 %v1754_v47, %v1327_v45 }
 0x796   : > { %v1336_v50 = vmul.f32 %v1754_v47, %v1328_v48 }
 0x798   : > { %v1341_v51 = vpack.c.bf16 %v1336_v50, %v1335_v49 }
 0x79a   : > { %1878 = vmatmul.mubr.msk.bf16.vlgmr.msra.gmra.mrb[20].mxu0 %vm597_vm1, %v1341_v51 }
 0x79b   : > { %1894 = vmatpush3.bf16.msra.mxu0 (!%p1763_p6), %v2021_v25  ;;  %1897 = vmatprep.mubr.msk.bf16.mxu0 (!%p1763_p6), %vm2095_vm7, %v2094_v26 }
 0x79c   : > { %1895 = vmatprep.subr.bf16.mxu0 (!%p1763_p6), %v2094_v26 }
 0x79f   : > { %1896 = vmatpush3.bf16.msra.mxu0 (!%p1763_p6), %v2022_v27 }
 0x86d   : > { %v1391_v56 = vpop.f32.mrb[20].mxu0 }
 0x86e   : > { %1412 = vrot.lane.b32.xlu0 %v1391_v56, %s2085_s12  ;;  %v1879_v57 = vpop.f32.mrb[21].mxu0  ;;  %v1398_v60 = vsub.f32 0.0, %v1391_v56 }
 0x86f   : > { %v1394_v58 = vpop.f32.mrb[22].mxu0 }
 0x870   : > { %1414 = vrot.lane.b32.xlu1 %v1394_v58, %s2085_s12  ;;  %v1880_v59 = vpop.f32.mrb[23].mxu0  ;;  %v1399_v61 = vsub.f32 0.0, %v1394_v58  ;;  %v1400_v62 = vmul.f32 1.442695, %v1398_v60 }
 0x872   : > { %v1402_v63 = vmul.f32 1.442695, %v1399_v61  ;;  %2013 = vpow2.f32 %v1400_v62 }
 0x874   : > { %2015 = vpow2.f32 %v1402_v63 }
 0x87c   : > { %v2014_v0 = vpop.eup %2013 }
 0x87d   : > { %v1404_v4 = vadd.f32 1.0, %v2014_v0 }
 0x87e   : > { %v2016_v1 = vpop.eup %2015 }
 0x87f   : > { %v1405_v9 = vadd.f32 1.0, %v2016_v1  ;;  %2017 = vrcp.f32 %v1404_v4 }
 0x881   : > { %2019 = vrcp.f32 %v1405_v9 }
 0x889   : > { %v2018_v5 = vpop.eup %2017 }
 0x88a   : > { %v1408_v8 = vmul.f32 %v2018_v5, %v1391_v56 }
 0x88b   : > { %v2020_v6 = vpop.eup %2019 }
 0x88c   : > { %v1409_v10 = vmul.f32 %v2020_v6, %v1394_v58 }
 0x8e0   : > { %v1413_v7 = vpop.permute.xlu0 %1412 }
 0x8e1   : > { %v1418_v12 = vmul.f32 %v1413_v7, %v1408_v8 }
 0x8e2   : > { %v1415_v11 = vpop.permute.xlu1 %1414 }
 0x8e3   : > { %v1419_v13 = vmul.f32 %v1415_v11, %v1409_v10 }
 0x8e5   : > { %v1428_v14 = vpack.c.bf16 %v1419_v13, %v1418_v12 }
 0x8e7   : > { %1890 = vmatmul.mubr.msk.bf16.vlgmr.msra.gmra.mrb[20].mxu1 %vm1453_vm6, %v1428_v14 }
 0x9b9   : > { %1505 = sbr.rel (%p1763_p6) target bundleno = 2878 (0xb3e), region = 84 }
 0x9ba   : > { %v1491_v15 = vpop.f32.mrb[20].mxu1 }
 0x9bb   : > { %v1498_v16 = vadd.f32 %v1491_v15, %v2369_v29  ;;  %v1891_v17 = vpop.f32.mrb[21].mxu1 }
 0x9bc   : > { %v1494_v18 = vpop.f32.mrb[22].mxu1 }
 0x9bd   : > { %1500 = vst.msk [vmem:[#allocation2] sm:$0xff] %vm597_vm1, %v1498_v16  ;;  %v1499_v19 = vadd.f32 %v1494_v18, %v2372_v32  ;;  %v1892_v20 = vpop.f32.mrb[23].mxu1  ;;  %v1507_v21 = vmul.f32 (!%p1763_p6), %v1498_v16, %v1498_v16 }
 0x9bf   : > { %1501 = vst.msk [vmem:[#allocation2 + $0x8] sm:$0xff] %vm597_vm1, %v1499_v19  ;;  %v1508_v22 = vmul.f32 (!%p1763_p6), %v1499_v19, %v1499_v19  ;;  %v1509_v23 = vsel (!%p1763_p6), %vm597_vm1, %v1507_v21, 0.0 }
 0x9c0   : > { %1510 = vadd.xlane.f32.xlu0 %v1509_v23 }
 0x9c1   : > { %v1512_v24 = vsel %vm597_vm1, %v1508_v22, 0.0 }
 0x9c4   : > { %1513 = vadd.xlane.f32.xlu0 %v1512_v24 }
 0xa4d   : > { %v1511_v28 = vpop.xlane.xlu0 %1510 }
 0xa4e   : > { %v1515_v29 = vmul.f32 0.03125, %v1511_v28 }
 0xa50   : > { %v1517_v30 = vadd.f32 1e-05, %v1515_v29 }
 0xa51   : > { %v1514_v31 = vpop.xlane.xlu0 %1513 }
 0xa52   : > { %2023 = vrsqrt.f32 %v1517_v30  ;;  %v1516_v32 = vmul.f32 0.03125, %v1514_v31 }
 0xa54   : > { %v1518_v33 = vadd.f32 1e-05, %v1516_v32 }
 0xa56   : > { %2025 = vrsqrt.f32 %v1518_v33 }
 0xa5c   : > { %v2024_v34 = vpop.eup %2023 }
 0xa5d   : > { %v1521_v40 = vmul.f32 %v2024_v34, %v1498_v16 }
 0xa5f   : > { %v1529_v3 = vmul.f32 %v1764_v36, %v1521_v40 }
 0xa60   : > { %v2026_v35 = vpop.eup %2025 }
 0xa61   : > { %v1522_v2 = vmul.f32 %v2026_v35, %v1499_v19 }
 0xa63   : > { %v1530_v37 = vmul.f32 %v1764_v36, %v1522_v2 }
 0xa65   : > { %v1535_v38 = vpack.c.bf16 %v1530_v37, %v1529_v3 }
 0xa67   : > { %1898 = vmatmul.mubr.msk.bf16.vlgmr.msra.gmra.mrb[0].mxu0 %vm597_vm1, %v1535_v38 }
 0xb3a   : > { %v1585_v39 = vpop.f32.mrb[0].mxu0 }
 0xb3b   : > { %1592 = vst [vmem:[#allocation3] sm:$0xff] %v1585_v39  ;;  %v1899_v41 = vpop.f32.mrb[1].mxu0 }
 0xb3c   : > { %v1588_v42 = vpop.f32.mrb[2].mxu0 }
 0xb3d   : > { %1593 = vst [vmem:[#allocation3 + $0x8] sm:$0xff] %v1588_v42  ;;  %v1900_v43 = vpop.f32.mrb[3].mxu0 }
 0xb3e PF: > { %s2480_s15 = sld [smem:[#allocation7_spill]]  ;;  %s2096_s27 = smov [#allocation3]  }
 0xb3f   : > { %s1603_s24 = sshll.u32 %s2096_s27, 4  ;;  %s1604_s24 = int_to_ptr.vmem [resolvable:$true] %s1603_s24 }
 0xb40   : > { %s2027_s26 = scalar_lea.vmem %s1604_s24, 256  ;;  %p2034_p11 = scmp.lt.s32.totalorder %s1604_s24, %s1604_s24 }
 0xb41   : > { %p2028_p8 = scmp.ne.s32.totalorder %s1604_s24, %s2027_s26  ;;  %p2035_p12 = scmp.lt.s32.totalorder %s2027_s26, %s2027_s26 }
 0xb43   : > { %p2036_p13 = por %p2035_p12, %p2034_p11 }
 0xb44   : > { %s2481_s22 = sadd.s32 4294967295, %s2480_s15  }
 0xb45   : > { %p2419_p7 = scmp.eq.s32.totalorder %s2481_s22, 1 }
 0xb47   : > { %p2029_p9 = pnand %p2028_p8, %p2419_p7 }
 0xb49   : > { %p2030_p10 = pneg %p2029_p9 }
 0xb4b   : > { %p2037_p0 = pnand %p2036_p13, %p2030_p10 }
 0xb4d   : > { %2040 = shalt.err (!%p2037_p0)
}
 0xb4e   : > { %s2483_s28 = sld [smem:[#allocation10_spill]] }
 0xb54   : > { %s2041_s20 = scalar_lea.hbm %s2483_s28, 256 }
 0xb55   : > { %p2042_p1 = scmp.ne.s32.totalorder %s2483_s28, %s2041_s20  ;;  %p2047_p4 = scmp.lt.u32.totalorder %s2041_s20, %s2483_s28 }
 0xb57   : > { %p2043_p2 = pnand %p2042_p1, %p2419_p7 }
 0xb59   : > { %p2044_p3 = pneg %p2043_p2 }
 0xb5b   : > { %p2049_p5 = pnand %p2047_p4, %p2044_p3 }
 0xb5d   : > { %2052 = shalt.err (!%p2049_p5)
}
 0xb5e   : > { %s2097_s29 = smov 128  }
 0xb5f   : > { %1902 = dma.vmem_to_hbm [thread:$0]  (%p2419_p7), %s1604_s24, 256, %s2483_s28, [#allocation4], %s2097_s29, %s2097_s29, %s2092_s19  }
 0xb60   : > { %2066 = dma.done.wait (%p2419_p7), [#allocation4], 256  }
 0xb61   : > { %2068 = vsyncadd (%p2419_p7), [#allocation4], 4294967040 }
 0xb62 PF: > { %s2484_s15 = sld [smem:[#allocation7_spill]]  ;;  %s2485_s29 = sld [smem:[#allocation6_spill]] }
 0xb63   : > { %s2486_s30 = sld [smem:[#allocation8_spill]] }
 0xb68   : > { %s25_s15 = sadd.s32 1, %s2484_s15  }
 0xb69   : > { %p22_p6 = scmp.ge.s32.totalorder %s25_s15, 4  }
 0xb6b   :  { %24 = sbr.rel (!%p22_p6) target bundleno = 5 (0x5), region = 130 }
 0xb72   :  { %1619 = vsyncpa [#allocation4], 1 }
 0xb73   :  { %1621 = vsyncpa [#allocation4 + $0x1], 1 }

</bundles_post_ra>
